<compile_context>
chip_gen: v6e
topology: v6e:2x2x1
jax: 0.10.0
libtpu: 0.0.40
codegen_flags: <defaults>
</compile_context>

<pallas_src>
import math
from functools import partial

import jax
import jax.numpy as jnp
from jax import lax
from jax.experimental import pallas as pl
from jax.experimental.pallas import tpu as pltpu


def _round_up(x, m):
    return ((x + m - 1) // m) * m


def _transformer_layer_kernel(
    # inputs
    xq_ref, xkv_ref,
    wq_ref, bq_ref, wkv_ref, bkv_ref,
    wo_ref, bo_ref, w1_ref, b1_ref, w2_ref, b2_ref,
    # outputs
    out_ref, att_ref,
    # scratch
    k_sc, v_sc, ctx_sc,
    *, num_heads, d_heads, d_internal, seq_len, block_q, causal_mask, exp_dtype,
):
    H, dh = num_heads, d_heads
    s_pad = k_sc.shape[1]          # padded sequence length (static)
    qi = pl.program_id(1)

    # ---- K/V projection: ONCE per batch row, carried across q-tiles in VMEM
    #      scratch (q axis is "arbitrary").  One wide bf16 matmul, f32 accum.
    @pl.when(qi == 0)
    def _():
        xkv = xkv_ref[0]                                             # (S, D) bf16
        kv = jnp.dot(xkv, wkv_ref[...],
                     preferred_element_type=jnp.float32) + bkv_ref[0]
        kvb = kv.astype(jnp.bfloat16)                                # (S, 2*d_int)
        for h in range(H):                                           # head-major scratch
            k_sc[h] = kvb[:, h * dh:(h + 1) * dh]
            v_sc[h] = kvb[:, d_internal + h * dh:d_internal + (h + 1) * dh]

    # ---- Q projection for this q-tile (1/sqrt(dh) already folded in). ----
    xq = xq_ref[0]                                                   # (Bq, D) f32
    q = jnp.dot(xq.astype(jnp.bfloat16), wq_ref[...],
                preferred_element_type=jnp.float32) + bq_ref[0]      # (Bq, d_int)
    qh = jnp.stack([q[:, h * dh:(h + 1) * dh] for h in range(H)],
                   axis=0).astype(jnp.bfloat16)                      # (H, Bq, dh)

    kh = k_sc[...]                                                   # (H, S, dh) bf16
    vh = v_sc[...]

    # ---- Attention scores for all heads with one batched MXU contraction. ----
    scores = jnp.einsum("hqd,hkd->hqk", qh, kh,
                        preferred_element_type=jnp.float32)          # (H, Bq, S) f32

    if causal_mask or seq_len < s_pad:
        q0 = qi * block_q
        row = q0 + lax.broadcasted_iota(jnp.int32, (block_q, s_pad), 0)
        col = lax.broadcasted_iota(jnp.int32, (block_q, s_pad), 1)
        masked = None
        if causal_mask:
            masked = col > row
        if seq_len < s_pad:                      # zero-padded key columns
            pad = col >= seq_len
            masked = pad if masked is None else (masked | pad)
        bias = jnp.where(masked, jnp.float32(-1e30), jnp.float32(0.0))
        scores = scores + bias[None]             # one additive mask for all heads
    # TODO(synk): skip fully-masked kv tiles (flash-style) for causal long S.

    # ---- Softmax: reductions in f32; exp/normalize in bf16 where the EUP has
    #      a bf16 path (v6e/v7x), f32 on v5-class chips. ----
    m = jnp.max(scores, axis=-1, keepdims=True)
    p = jnp.exp((scores - m).astype(exp_dtype))
    denom = jnp.sum(p.astype(jnp.float32), axis=-1, keepdims=True)
    inv = pl.reciprocal(denom, approx=True).astype(exp_dtype)
    attn = p * inv                                                   # (H, Bq, S)
    attn_b = attn.astype(jnp.bfloat16)

    att_ref[0] = attn_b.astype(att_ref.dtype)    # single lane-dense bf16 store

    # ---- Context + fused output projection (single K = d_internal matmul). ----
    ctx = jnp.einsum("hqk,hkd->hqd", attn_b, vh,
                     preferred_element_type=jnp.float32)             # (H, Bq, dh)
    for h in range(H):                           # concat heads -> (Bq, d_internal)
        ctx_sc[:, h * dh:(h + 1) * dh] = ctx[h]
    proj = jnp.dot(ctx_sc[...].astype(jnp.bfloat16), wo_ref[...],
                   preferred_element_type=jnp.float32)
    res1 = proj + bo_ref[0] + xq                                     # residual (f32)

    # ---- Feed-forward (Linear -> ReLU -> Linear) + residual. ----
    h1 = jnp.dot(res1.astype(jnp.bfloat16), w1_ref[...],
                 preferred_element_type=jnp.float32) + b1_ref[0]
    h1 = jnp.maximum(h1, 0.0)
    h2 = jnp.dot(h1.astype(jnp.bfloat16), w2_ref[...],
                 preferred_element_type=jnp.float32) + b2_ref[0]
    out_ref[0] = (h2 + res1).astype(out_ref.dtype)


# Only these failure modes of the Buffered(1) specs trigger the fallback
# (narrower than `except Exception`, per review).
_BUFFERED_SPEC_ERRORS = (TypeError, ValueError, AssertionError,
                         NotImplementedError, pltpu.LoweringException)


def transformer_layer_forward(x, params, *, num_heads, causal_mask,
                              block_q=None, att_dtype=jnp.bfloat16):
    """x: (B, S, d_model) or (S, d_model). Returns (out, att_maps).

    `att_maps` is emitted in bf16 by default (pass att_dtype=jnp.float32 to
    match the PyTorch dtype exactly); values agree within bf16 precision.
    """
    squeezed = False
    if x.ndim == 2:
        x = x[None]
        squeezed = True
    x = x.astype(jnp.float32)
    B, S, D = x.shape

    d_internal = params["wq"].shape[1]
    assert d_internal % num_heads == 0, "d_internal must be divisible by num_heads"
    dh = d_internal // num_heads
    d_ff = params["w1"].shape[1]

    # --- Per-generation tile / VMEM budget. ---
    kind = jax.devices()[0].device_kind.lower()
    try:
        vmem_cap = int(pltpu.get_tpu_info().vmem_capacity_bytes)
    except Exception:
        # Read-only hardware probe; fall back to a device_kind heuristic
        # (conservative 64 MiB for v7x-like parts).  Does not affect semantics.
        vmem_cap = (64 if ("v7" in kind or "7x" in kind) else 128) * 1024 * 1024
    big_vmem = vmem_cap >= 100 * 1024 * 1024
    vmem_limit = (96 if big_vmem else 48) * 1024 * 1024
    # v5-class (and older) chips have no bf16 VPU/EUP path -> keep exp in f32.
    exp_dtype = jnp.float32 if ("v5" in kind or "v4" in kind or "v3" in kind) \
        else jnp.bfloat16

    if block_q is None:
        block_q = 256 if big_vmem else (64 if S >= 4096 else 128)
    block_q = _round_up(min(block_q, _round_up(S, 8)), 8)
    S_pad = _round_up(S, block_q)
    n_q = S_pad // block_q

    # Zero-pad the sequence: padded key columns are masked in-kernel, padded
    # query rows are sliced off below (no block_q = S collapse for odd S).
    x_p = x if S_pad == S else jnp.pad(x, ((0, 0), (0, S_pad - S), (0, 0)))
    xq_in = x_p                                  # f32 (residual path)
    xkv_in = x_p.astype(jnp.bfloat16)            # bf16 K/V operand: half DMA/VMEM

    # --- One-time weight prep: bf16 matmul operands, fused K/V weight,
    #     1/sqrt(dh) folded into wq/bq.  Biases stay f32. ---
    scale = 1.0 / math.sqrt(dh)
    wq = (params["wq"] * scale).astype(jnp.bfloat16)
    bq = (params["bq"] * scale).astype(jnp.float32)
    wkv = jnp.concatenate([params["wk"], params["wv"]], axis=1).astype(jnp.bfloat16)
    bkv = jnp.concatenate([params["bk"], params["bv"]], axis=1).astype(jnp.float32)
    wo = params["wo"].astype(jnp.bfloat16)
    bo = params["bo"].astype(jnp.float32)
    w1 = params["w1"].astype(jnp.bfloat16)
    b1 = params["b1"].astype(jnp.float32)
    w2 = params["w2"].astype(jnp.bfloat16)
    b2 = params["b2"].astype(jnp.float32)

    kernel = partial(
        _transformer_layer_kernel,
        num_heads=num_heads, d_heads=dh, d_internal=d_internal,
        seq_len=S, block_q=block_q, causal_mask=causal_mask, exp_dtype=exp_dtype,
    )

    weight_bytes = 2 * int(wq.size + wkv.size + wo.size + w1.size + w2.size)
    att_bytes = B * num_heads * S_pad * S_pad * jnp.dtype(att_dtype).itemsize
    cost = pl.CostEstimate(
        flops=int(2 * B * S_pad * D * 3 * d_internal        # Q,K,V projections
                  + 4 * B * d_internal * S_pad * S_pad      # scores + attn@V
                  + 2 * B * S_pad * d_internal * D          # output projection
                  + 4 * B * S_pad * D * d_ff),              # FFN
        transcendentals=int(B * num_heads * S_pad * S_pad),
        bytes_accessed=int(B * S_pad * D * (4 + 2 + 4) + att_bytes + weight_bytes),
    )

    def build(single_buffer_weights):
        def wspec(shape):
            zeros = (0,) * len(shape)
            if single_buffer_weights:
                # Grid-invariant operand: one VMEM buffer instead of two.
                return pl.BlockSpec(shape, lambda b, qi: zeros,
                                    pipeline_mode=pl.Buffered(1))
            return pl.BlockSpec(shape, lambda b, qi: zeros)

        return pl.pallas_call(
            kernel,
            out_shape=(
                jax.ShapeDtypeStruct((B, S_pad, D), jnp.float32),
                jax.ShapeDtypeStruct((B, num_heads, S_pad, S_pad), att_dtype),
            ),
            grid_spec=pltpu.PrefetchScalarGridSpec(
                num_scalar_prefetch=0,
                grid=(B, n_q),
                in_specs=[
                    pl.BlockSpec((1, block_q, D), lambda b, qi: (b, qi, 0)),  # q rows (f32)
                    pl.BlockSpec((1, S_pad, D), lambda b, qi: (b, 0, 0)),     # k/v rows (bf16)
                    wspec((D, d_internal)), wspec((1, d_internal)),           # wq, bq
                    wspec((D, 2 * d_internal)), wspec((1, 2 * d_internal)),   # wkv, bkv
                    wspec((d_internal, D)), wspec((1, D)),                    # wo, bo
                    wspec((D, d_ff)), wspec((1, d_ff)),                       # w1, b1
                    wspec((d_ff, D)), wspec((1, D)),                          # w2, b2
                ],
                out_specs=[
                    pl.BlockSpec((1, block_q, D), lambda b, qi: (b, qi, 0)),
                    pl.BlockSpec((1, num_heads, block_q, S_pad),
                                 lambda b, qi: (b, 0, qi, 0)),
                ],
                scratch_shapes=[
                    pltpu.VMEM((num_heads, S_pad, dh), jnp.bfloat16),   # K head-major
                    pltpu.VMEM((num_heads, S_pad, dh), jnp.bfloat16),   # V head-major
                    pltpu.VMEM((block_q, d_internal), jnp.float32),     # head concat
                ],
            ),
            compiler_params=pltpu.CompilerParams(
                # batch axis parallel (megacore / v7x 2nd TC); q axis arbitrary
                # because the K/V scratch is carried across q-tiles.
                dimension_semantics=("parallel", "arbitrary"),
                vmem_limit_bytes=vmem_limit,
            ),
            cost_estimate=cost,
        )

    args = (xq_in, xkv_in, wq, bq, wkv, bkv, wo, bo, w1, b1, w2, b2)
    if hasattr(pl, "Buffered"):
        try:
            out, att = build(True)(*args)
        except _BUFFERED_SPEC_ERRORS:
            out, att = build(False)(*args)
    else:
        out, att = build(False)(*args)

    if S_pad != S:
        out = out[:, :S]
        att = att[:, :, :S, :S]
    if squeezed:
        out = out[0]
        att = att[0]
    return out, att


def _reference_forward(x, params, *, num_heads, causal_mask):
    """Pure-JAX f32 reference mirroring the PyTorch module (sanity check)."""
    B, S, D = x.shape
    d_internal = params["wq"].shape[1]
    dh = d_internal // num_heads

    def lin(a, w, b):
        return a @ w + b[0]

    q = lin(x, params["wq"], params["bq"]).reshape(B, S, num_heads, dh).transpose(0, 2, 1, 3)
    k = lin(x, params["wk"], params["bk"]).reshape(B, S, num_heads, dh).transpose(0, 2, 1, 3)
    v = lin(x, params["wv"], params["bv"]).reshape(B, S, num_heads, dh).transpose(0, 2, 1, 3)
    scores = jnp.einsum("bhqd,bhkd->bhqk", q, k) / math.sqrt(dh)
    if causal_mask:
        mask = jnp.triu(jnp.ones((S, S)), k=1)
        scores = scores + jnp.where(mask == 1, -jnp.inf, 0.0)
    att = jax.nn.softmax(scores, axis=-1)
    ao = jnp.einsum("bhqk,bhkd->bhqd", att, v).transpose(0, 2, 1, 3).reshape(B, S, d_internal)
    res1 = lin(ao, params["wo"], params["bo"]) + x
    h1 = jax.nn.relu(lin(res1, params["w1"], params["b1"]))
    out = lin(h1, params["w2"], params["b2"]) + res1
    return out, att


def init_params(key, d_model, d_internal):
    d_ff = d_model * 2
    shapes = {
        "wq": (d_model, d_internal), "bq": (1, d_internal),
        "wk": (d_model, d_internal), "bk": (1, d_internal),
        "wv": (d_model, d_internal), "bv": (1, d_internal),
        "wo": (d_internal, d_model), "bo": (1, d_model),
        "w1": (d_model, d_ff), "b1": (1, d_ff),
        "w2": (d_ff, d_model), "b2": (1, d_model),
    }
    params = {}
    keys = jax.random.split(key, len(shapes))
    for k_, (name, shape) in zip(keys, shapes.items()):
        params[name] = (0.05 * jax.random.normal(k_, shape)).astype(jnp.float32)
    return params


if __name__ == "__main__":
    root = jax.random.PRNGKey(0)
    kx, kp, kx2 = jax.random.split(root, 3)

    # --- Config 1: batched, causal, seq divisible by 8. ---
    batch, seq, d_model, d_internal, num_heads = 2, 8, 32, 32, 4
    x = jax.random.normal(kx, (batch, seq, d_model), dtype=jnp.float32)
    params = init_params(kp, d_model, d_internal)

    out, att = transformer_layer_forward(x, params, num_heads=num_heads,
                                         causal_mask=True)
    out = jax.block_until_ready(out)
    att = jax.block_until_ready(att)

    ref_out, ref_att = _reference_forward(x, params, num_heads=num_heads,
                                          causal_mask=True)
    assert out.shape == (batch, seq, d_model)
    assert att.shape == (batch, num_heads, seq, seq)
    assert jnp.allclose(out, ref_out, atol=2e-2, rtol=2e-2)
    assert jnp.allclose(att.astype(jnp.float32), ref_att, atol=1e-2, rtol=1e-2)

    # --- Config 2: 2-D input, non-causal, odd seq length (padding path). ---
    seq2 = 10
    x2 = jax.random.normal(kx2, (seq2, d_model), dtype=jnp.float32)
    out2, att2 = transformer_layer_forward(x2, params, num_heads=num_heads,
                                           causal_mask=False)
    out2 = jax.block_until_ready(out2)
    att2 = jax.block_until_ready(att2)
    ref_out2, ref_att2 = _reference_forward(x2[None], params, num_heads=num_heads,
                                            causal_mask=False)
    assert out2.shape == (seq2, d_model)
    assert att2.shape == (num_heads, seq2, seq2)
    assert jnp.allclose(out2, ref_out2[0], atol=2e-2, rtol=2e-2)
    assert jnp.allclose(att2.astype(jnp.float32), ref_att2[0], atol=1e-2, rtol=1e-2)

    print("KERNEL_OK")
</pallas_src>

<mosaic_0001>
module attributes {stable_mosaic.version = 11 : i64} {
  func.func @_transformer_layer_kernel(%arg0: i32, %arg1: i32, %arg2: memref<1x8x32xf32, #tpu.memory_space<vmem>>, %arg3: memref<1x8x32xbf16, #tpu.memory_space<vmem>>, %arg4: memref<32x32xbf16, #tpu.memory_space<vmem>>, %arg5: memref<1x32xf32, #tpu.memory_space<vmem>>, %arg6: memref<32x64xbf16, #tpu.memory_space<vmem>>, %arg7: memref<1x64xf32, #tpu.memory_space<vmem>>, %arg8: memref<32x32xbf16, #tpu.memory_space<vmem>>, %arg9: memref<1x32xf32, #tpu.memory_space<vmem>>, %arg10: memref<32x64xbf16, #tpu.memory_space<vmem>>, %arg11: memref<1x64xf32, #tpu.memory_space<vmem>>, %arg12: memref<64x32xbf16, #tpu.memory_space<vmem>>, %arg13: memref<1x32xf32, #tpu.memory_space<vmem>>, %arg14: memref<1x8x32xf32, #tpu.memory_space<vmem>>, %arg15: memref<1x4x8x8xbf16, #tpu.memory_space<vmem>>, %arg16: memref<4x8x8xbf16, #tpu.memory_space<vmem>>, %arg17: memref<4x8x8xbf16, #tpu.memory_space<vmem>>, %arg18: memref<8x32xf32, #tpu.memory_space<vmem>>) attributes {dimension_semantics = [#tpu.dimension_semantics<parallel>, #tpu.dimension_semantics<arbitrary>], iteration_bounds = array<i64: 2, 1>, scalar_prefetch = 0 : i64, scratch_operands = 3 : i64, tpu.core_type = #tpu.core_type<tc>, window_params = [{transform_indices = @transform_0, window_bounds = array<i64: 1, 8, 32>}, {transform_indices = @transform_1, window_bounds = array<i64: 1, 8, 32>}, {pipeline_mode = #tpu.pipeline_mode<synchronous>, transform_indices = @transform_2, window_bounds = array<i64: 32, 32>}, {pipeline_mode = #tpu.pipeline_mode<synchronous>, transform_indices = @transform_3, window_bounds = array<i64: 1, 32>}, {pipeline_mode = #tpu.pipeline_mode<synchronous>, transform_indices = @transform_4, window_bounds = array<i64: 32, 64>}, {pipeline_mode = #tpu.pipeline_mode<synchronous>, transform_indices = @transform_5, window_bounds = array<i64: 1, 64>}, {pipeline_mode = #tpu.pipeline_mode<synchronous>, transform_indices = @transform_6, window_bounds = array<i64: 32, 32>}, {pipeline_mode = #tpu.pipeline_mode<synchronous>, transform_indices = @transform_7, window_bounds = array<i64: 1, 32>}, {pipeline_mode = #tpu.pipeline_mode<synchronous>, transform_indices = @transform_8, window_bounds = array<i64: 32, 64>}, {pipeline_mode = #tpu.pipeline_mode<synchronous>, transform_indices = @transform_9, window_bounds = array<i64: 1, 64>}, {pipeline_mode = #tpu.pipeline_mode<synchronous>, transform_indices = @transform_10, window_bounds = array<i64: 64, 32>}, {pipeline_mode = #tpu.pipeline_mode<synchronous>, transform_indices = @transform_11, window_bounds = array<i64: 1, 32>}, {transform_indices = @transform_12, window_bounds = array<i64: 1, 8, 32>}, {transform_indices = @transform_13, window_bounds = array<i64: 1, 4, 8, 8>}]} {
    %c0_i32 = arith.constant 0 : i32
    %0 = arith.cmpi eq, %arg1, %c0_i32 : i32
    %1 = arith.extui %0 : i1 to i32
    %c0_i32_0 = arith.constant 0 : i32
    %2 = arith.cmpi ne, %1, %c0_i32_0 : i32
    scf.if %2 {
      %c0_49 = arith.constant 0 : index
      %c0_50 = arith.constant 0 : index
      %c0_51 = arith.constant 0 : index
      %99 = vector.load %arg3[%c0_49, %c0_50, %c0_51] : memref<1x8x32xbf16, #tpu.memory_space<vmem>>, vector<1x8x32xbf16>
      %100 = vector.shape_cast %99 : vector<1x8x32xbf16> to vector<8x32xbf16>
      %c0_52 = arith.constant 0 : index
      %c0_53 = arith.constant 0 : index
      %101 = vector.load %arg6[%c0_52, %c0_53] : memref<32x64xbf16, #tpu.memory_space<vmem>>, vector<32x64xbf16>
      %cst_54 = arith.constant dense<0.000000e+00> : vector<8x64xf32>
      %102 = tpu.matmul %100, %101, %cst_54 {dimension_numbers = #tpu.dot_dimension_numbers<[1], [0], [0], [1], [0, 0, 1, 1], [], []>} : vector<8x32xbf16>, vector<32x64xbf16>, vector<8x64xf32> -> vector<8x64xf32>
      %c0_55 = arith.constant 0 : index
      %c0_56 = arith.constant 0 : index
      %103 = vector.load %arg7[%c0_55, %c0_56] : memref<1x64xf32, #tpu.memory_space<vmem>>, vector<1x64xf32>
      %104 = vector.shape_cast %103 : vector<1x64xf32> to vector<64xf32>
      %105 = vector.shape_cast %104 : vector<64xf32> to vector<1x64xf32>
      %106 = vector.broadcast %105 : vector<1x64xf32> to vector<8x64xf32>
      %107 = arith.addf %102, %106 : vector<8x64xf32>
      %108 = arith.truncf %107 : vector<8x64xf32> to vector<8x64xbf16>
      %109 = vector.extract_strided_slice %108 {offsets = [0, 0], sizes = [8, 8], strides = [1, 1]} : vector<8x64xbf16> to vector<8x8xbf16>
      %c0_57 = arith.constant 0 : index
      %c0_58 = arith.constant 0 : index
      %c0_59 = arith.constant 0 : index
      %110 = vector.load %arg16[%c0_57, %c0_58, %c0_59] : memref<4x8x8xbf16, #tpu.memory_space<vmem>>, vector<1x8x8xbf16>
      %111 = vector.shape_cast %110 : vector<1x8x8xbf16> to vector<8x8xbf16>
      %112 = vector.shape_cast %109 : vector<8x8xbf16> to vector<1x8x8xbf16>
      tpu.vector_store %arg16[%c0_57, %c0_58, %c0_59], %112 {strides = array<i32>} : memref<4x8x8xbf16, #tpu.memory_space<vmem>>, vector<1x8x8xbf16>,
      %113 = vector.extract_strided_slice %108 {offsets = [0, 32], sizes = [8, 8], strides = [1, 1]} : vector<8x64xbf16> to vector<8x8xbf16>
      %c0_60 = arith.constant 0 : index
      %c0_61 = arith.constant 0 : index
      %c0_62 = arith.constant 0 : index
      %114 = vector.load %arg17[%c0_60, %c0_61, %c0_62] : memref<4x8x8xbf16, #tpu.memory_space<vmem>>, vector<1x8x8xbf16>
      %115 = vector.shape_cast %114 : vector<1x8x8xbf16> to vector<8x8xbf16>
      %116 = vector.shape_cast %113 : vector<8x8xbf16> to vector<1x8x8xbf16>
      tpu.vector_store %arg17[%c0_60, %c0_61, %c0_62], %116 {strides = array<i32>} : memref<4x8x8xbf16, #tpu.memory_space<vmem>>, vector<1x8x8xbf16>,
      %117 = vector.extract_strided_slice %108 {offsets = [0, 8], sizes = [8, 8], strides = [1, 1]} : vector<8x64xbf16> to vector<8x8xbf16>
      %c1 = arith.constant 1 : index
      %c0_63 = arith.constant 0 : index
      %c0_64 = arith.constant 0 : index
      %118 = vector.load %arg16[%c1, %c0_63, %c0_64] : memref<4x8x8xbf16, #tpu.memory_space<vmem>>, vector<1x8x8xbf16>
      %119 = vector.shape_cast %118 : vector<1x8x8xbf16> to vector<8x8xbf16>
      %120 = vector.shape_cast %117 : vector<8x8xbf16> to vector<1x8x8xbf16>
      tpu.vector_store %arg16[%c1, %c0_63, %c0_64], %120 {strides = array<i32>} : memref<4x8x8xbf16, #tpu.memory_space<vmem>>, vector<1x8x8xbf16>,
      %121 = vector.extract_strided_slice %108 {offsets = [0, 40], sizes = [8, 8], strides = [1, 1]} : vector<8x64xbf16> to vector<8x8xbf16>
      %c1_65 = arith.constant 1 : index
      %c0_66 = arith.constant 0 : index
      %c0_67 = arith.constant 0 : index
      %122 = vector.load %arg17[%c1_65, %c0_66, %c0_67] : memref<4x8x8xbf16, #tpu.memory_space<vmem>>, vector<1x8x8xbf16>
      %123 = vector.shape_cast %122 : vector<1x8x8xbf16> to vector<8x8xbf16>
      %124 = vector.shape_cast %121 : vector<8x8xbf16> to vector<1x8x8xbf16>
      tpu.vector_store %arg17[%c1_65, %c0_66, %c0_67], %124 {strides = array<i32>} : memref<4x8x8xbf16, #tpu.memory_space<vmem>>, vector<1x8x8xbf16>,
      %125 = vector.extract_strided_slice %108 {offsets = [0, 16], sizes = [8, 8], strides = [1, 1]} : vector<8x64xbf16> to vector<8x8xbf16>
      %c2 = arith.constant 2 : index
      %c0_68 = arith.constant 0 : index
      %c0_69 = arith.constant 0 : index
      %126 = vector.load %arg16[%c2, %c0_68, %c0_69] : memref<4x8x8xbf16, #tpu.memory_space<vmem>>, vector<1x8x8xbf16>
      %127 = vector.shape_cast %126 : vector<1x8x8xbf16> to vector<8x8xbf16>
      %128 = vector.shape_cast %125 : vector<8x8xbf16> to vector<1x8x8xbf16>
      tpu.vector_store %arg16[%c2, %c0_68, %c0_69], %128 {strides = array<i32>} : memref<4x8x8xbf16, #tpu.memory_space<vmem>>, vector<1x8x8xbf16>,
      %129 = vector.extract_strided_slice %108 {offsets = [0, 48], sizes = [8, 8], strides = [1, 1]} : vector<8x64xbf16> to vector<8x8xbf16>
      %c2_70 = arith.constant 2 : index
      %c0_71 = arith.constant 0 : index
      %c0_72 = arith.constant 0 : index
      %130 = vector.load %arg17[%c2_70, %c0_71, %c0_72] : memref<4x8x8xbf16, #tpu.memory_space<vmem>>, vector<1x8x8xbf16>
      %131 = vector.shape_cast %130 : vector<1x8x8xbf16> to vector<8x8xbf16>
      %132 = vector.shape_cast %129 : vector<8x8xbf16> to vector<1x8x8xbf16>
      tpu.vector_store %arg17[%c2_70, %c0_71, %c0_72], %132 {strides = array<i32>} : memref<4x8x8xbf16, #tpu.memory_space<vmem>>, vector<1x8x8xbf16>,
      %133 = vector.extract_strided_slice %108 {offsets = [0, 24], sizes = [8, 8], strides = [1, 1]} : vector<8x64xbf16> to vector<8x8xbf16>
      %c3 = arith.constant 3 : index
      %c0_73 = arith.constant 0 : index
      %c0_74 = arith.constant 0 : index
      %134 = vector.load %arg16[%c3, %c0_73, %c0_74] : memref<4x8x8xbf16, #tpu.memory_space<vmem>>, vector<1x8x8xbf16>
      %135 = vector.shape_cast %134 : vector<1x8x8xbf16> to vector<8x8xbf16>
      %136 = vector.shape_cast %133 : vector<8x8xbf16> to vector<1x8x8xbf16>
      tpu.vector_store %arg16[%c3, %c0_73, %c0_74], %136 {strides = array<i32>} : memref<4x8x8xbf16, #tpu.memory_space<vmem>>, vector<1x8x8xbf16>,
      %137 = vector.extract_strided_slice %108 {offsets = [0, 56], sizes = [8, 8], strides = [1, 1]} : vector<8x64xbf16> to vector<8x8xbf16>
      %c3_75 = arith.constant 3 : index
      %c0_76 = arith.constant 0 : index
      %c0_77 = arith.constant 0 : index
      %138 = vector.load %arg17[%c3_75, %c0_76, %c0_77] : memref<4x8x8xbf16, #tpu.memory_space<vmem>>, vector<1x8x8xbf16>
      %139 = vector.shape_cast %138 : vector<1x8x8xbf16> to vector<8x8xbf16>
      %140 = vector.shape_cast %137 : vector<8x8xbf16> to vector<1x8x8xbf16>
      tpu.vector_store %arg17[%c3_75, %c0_76, %c0_77], %140 {strides = array<i32>} : memref<4x8x8xbf16, #tpu.memory_space<vmem>>, vector<1x8x8xbf16>,
    } else {
    }
    %c0 = arith.constant 0 : index
    %c0_1 = arith.constant 0 : index
    %c0_2 = arith.constant 0 : index
    %3 = vector.load %arg2[%c0, %c0_1, %c0_2] : memref<1x8x32xf32, #tpu.memory_space<vmem>>, vector<1x8x32xf32>
    %4 = vector.shape_cast %3 : vector<1x8x32xf32> to vector<8x32xf32>
    %5 = arith.truncf %4 : vector<8x32xf32> to vector<8x32xbf16>
    %c0_3 = arith.constant 0 : index
    %c0_4 = arith.constant 0 : index
    %6 = vector.load %arg4[%c0_3, %c0_4] : memref<32x32xbf16, #tpu.memory_space<vmem>>, vector<32x32xbf16>
    %cst = arith.constant dense<0.000000e+00> : vector<8x32xf32>
    %7 = tpu.matmul %5, %6, %cst {dimension_numbers = #tpu.dot_dimension_numbers<[1], [0], [0], [1], [0, 0, 1, 1], [], []>} : vector<8x32xbf16>, vector<32x32xbf16>, vector<8x32xf32> -> vector<8x32xf32>
    %c0_5 = arith.constant 0 : index
    %c0_6 = arith.constant 0 : index
    %8 = vector.load %arg5[%c0_5, %c0_6] : memref<1x32xf32, #tpu.memory_space<vmem>>, vector<1x32xf32>
    %9 = vector.shape_cast %8 : vector<1x32xf32> to vector<32xf32>
    %10 = vector.shape_cast %9 : vector<32xf32> to vector<1x32xf32>
    %11 = vector.broadcast %10 : vector<1x32xf32> to vector<8x32xf32>
    %12 = arith.addf %7, %11 : vector<8x32xf32>
    %13 = vector.extract_strided_slice %12 {offsets = [0, 0], sizes = [8, 8], strides = [1, 1]} : vector<8x32xf32> to vector<8x8xf32>
    %14 = vector.extract_strided_slice %12 {offsets = [0, 8], sizes = [8, 8], strides = [1, 1]} : vector<8x32xf32> to vector<8x8xf32>
    %15 = vector.extract_strided_slice %12 {offsets = [0, 16], sizes = [8, 8], strides = [1, 1]} : vector<8x32xf32> to vector<8x8xf32>
    %16 = vector.extract_strided_slice %12 {offsets = [0, 24], sizes = [8, 8], strides = [1, 1]} : vector<8x32xf32> to vector<8x8xf32>
    %17 = vector.shape_cast %13 : vector<8x8xf32> to vector<1x8x8xf32>
    %18 = vector.shape_cast %14 : vector<8x8xf32> to vector<1x8x8xf32>
    %19 = vector.shape_cast %15 : vector<8x8xf32> to vector<1x8x8xf32>
    %20 = vector.shape_cast %16 : vector<8x8xf32> to vector<1x8x8xf32>
    %21 = tpu.concatenate %17, %18, %19, %20 in 0 : vector<1x8x8xf32>, vector<1x8x8xf32>, vector<1x8x8xf32>, vector<1x8x8xf32> -> vector<4x8x8xf32>
    %22 = arith.truncf %21 : vector<4x8x8xf32> to vector<4x8x8xbf16>
    %c0_7 = arith.constant 0 : index
    %c0_8 = arith.constant 0 : index
    %c0_9 = arith.constant 0 : index
    %23 = vector.load %arg16[%c0_7, %c0_8, %c0_9] : memref<4x8x8xbf16, #tpu.memory_space<vmem>>, vector<4x8x8xbf16>
    %c0_10 = arith.constant 0 : index
    %c0_11 = arith.constant 0 : index
    %c0_12 = arith.constant 0 : index
    %24 = vector.load %arg17[%c0_10, %c0_11, %c0_12] : memref<4x8x8xbf16, #tpu.memory_space<vmem>>, vector<4x8x8xbf16>
    "tpu.trace_start"() <{level = 10 : i32, message = "hqd,hkd->hqk"}> : () -> ()
    %cst_13 = arith.constant dense<0.000000e+00> : vector<4x8x8xf32>
    %25 = tpu.matmul %22, %23, %cst_13 {dimension_numbers = #tpu.dot_dimension_numbers<[2], [2], [1], [1], [0, 0, 0, 1, 1, 1], [0], [0]>} : vector<4x8x8xbf16>, vector<4x8x8xbf16>, vector<4x8x8xf32> -> vector<4x8x8xf32>
    "tpu.trace_stop"() : () -> ()
    %c8_i32 = arith.constant 8 : i32
    %26 = arith.muli %arg1, %c8_i32 : i32
    %27 = tpu.iota {dimensions = array<i32: 0>} : vector<8x8xi32>
    %28 = vector.broadcast %26 : i32 to vector<8x8xi32>
    %29 = arith.addi %28, %27 : vector<8x8xi32>
    %30 = tpu.iota {dimensions = array<i32: 1>} : vector<8x8xi32>
    %31 = arith.cmpi sgt, %30, %29 : vector<8x8xi32>
    %cst_14 = arith.constant -1.000000e+30 : f32
    %cst_15 = arith.constant 0.000000e+00 : f32
    %32 = vector.broadcast %cst_14 : f32 to vector<8x8xf32>
    %33 = vector.broadcast %cst_15 : f32 to vector<8x8xf32>
    %34 = arith.select %31, %32, %33 : vector<8x8xi1>, vector<8x8xf32>
    %35 = vector.shape_cast %34 : vector<8x8xf32> to vector<1x8x8xf32>
    %36 = vector.broadcast %35 : vector<1x8x8xf32> to vector<4x8x8xf32>
    %37 = arith.addf %25, %36 : vector<4x8x8xf32>
    %cst_16 = arith.constant dense<0xFF800000> : vector<4x8xf32>
    %38 = vector.multi_reduction <maximumf>, %37, %cst_16 [2] : vector<4x8x8xf32> to vector<4x8xf32>
    %39 = vector.shape_cast %38 : vector<4x8xf32> to vector<4x8x1xf32>
    %40 = vector.broadcast %39 : vector<4x8x1xf32> to vector<4x8x8xf32>
    %41 = arith.subf %37, %40 : vector<4x8x8xf32>
    %42 = arith.truncf %41 : vector<4x8x8xf32> to vector<4x8x8xbf16>
    %43 = math.exp %42 : vector<4x8x8xbf16>
    %44 = arith.extf %43 : vector<4x8x8xbf16> to vector<4x8x8xf32>
    %cst_17 = arith.constant dense<0.000000e+00> : vector<4x8xf32>
    %45 = vector.multi_reduction <add>, %44, %cst_17 [2] : vector<4x8x8xf32> to vector<4x8xf32>
    %46 = vector.shape_cast %45 : vector<4x8xf32> to vector<4x8x1xf32>
    %47 = tpu.reciprocal %46 {approx = true} : vector<4x8x1xf32> -> vector<4x8x1xf32>
    %48 = arith.truncf %47 : vector<4x8x1xf32> to vector<4x8x1xbf16>
    %49 = vector.broadcast %48 : vector<4x8x1xbf16> to vector<4x8x8xbf16>
    %50 = arith.mulf %43, %49 : vector<4x8x8xbf16>
    %c0_18 = arith.constant 0 : index
    %c0_19 = arith.constant 0 : index
    %c0_20 = arith.constant 0 : index
    %c0_21 = arith.constant 0 : index
    %51 = vector.load %arg15[%c0_18, %c0_19, %c0_20, %c0_21] : memref<1x4x8x8xbf16, #tpu.memory_space<vmem>>, vector<1x4x8x8xbf16>
    %52 = vector.shape_cast %51 : vector<1x4x8x8xbf16> to vector<4x8x8xbf16>
    %53 = vector.shape_cast %50 : vector<4x8x8xbf16> to vector<1x4x8x8xbf16>
    tpu.vector_store %arg15[%c0_18, %c0_19, %c0_20, %c0_21], %53 {strides = array<i32>} : memref<1x4x8x8xbf16, #tpu.memory_space<vmem>>, vector<1x4x8x8xbf16>,
    "tpu.trace_start"() <{level = 10 : i32, message = "hqk,hkd->hqd"}> : () -> ()
    %cst_22 = arith.constant dense<0.000000e+00> : vector<4x8x8xf32>
    %54 = tpu.matmul %50, %24, %cst_22 {dimension_numbers = #tpu.dot_dimension_numbers<[2], [1], [1], [2], [0, 0, 0, 1, 1, 2], [0], [0]>} : vector<4x8x8xbf16>, vector<4x8x8xbf16>, vector<4x8x8xf32> -> vector<4x8x8xf32>
    "tpu.trace_stop"() : () -> ()
    %55 = vector.extract_strided_slice %54 {offsets = [0, 0, 0], sizes = [1, 8, 8], strides = [1, 1, 1]} : vector<4x8x8xf32> to vector<1x8x8xf32>
    %56 = vector.shape_cast %55 : vector<1x8x8xf32> to vector<8x8xf32>
    %c0_23 = arith.constant 0 : index
    %c0_24 = arith.constant 0 : index
    %57 = vector.load %arg18[%c0_23, %c0_24] : memref<8x32xf32, #tpu.memory_space<vmem>>, vector<8x8xf32>
    tpu.vector_store %arg18[%c0_23, %c0_24], %56 {strides = array<i32>} : memref<8x32xf32, #tpu.memory_space<vmem>>, vector<8x8xf32>,
    %58 = vector.extract_strided_slice %54 {offsets = [1, 0, 0], sizes = [1, 8, 8], strides = [1, 1, 1]} : vector<4x8x8xf32> to vector<1x8x8xf32>
    %59 = vector.shape_cast %58 : vector<1x8x8xf32> to vector<8x8xf32>
    %c0_25 = arith.constant 0 : index
    %c8 = arith.constant 8 : index
    %60 = vector.load %arg18[%c0_25, %c8] : memref<8x32xf32, #tpu.memory_space<vmem>>, vector<8x8xf32>
    tpu.vector_store %arg18[%c0_25, %c8], %59 {strides = array<i32>} : memref<8x32xf32, #tpu.memory_space<vmem>>, vector<8x8xf32>,
    %61 = vector.extract_strided_slice %54 {offsets = [2, 0, 0], sizes = [1, 8, 8], strides = [1, 1, 1]} : vector<4x8x8xf32> to vector<1x8x8xf32>
    %62 = vector.shape_cast %61 : vector<1x8x8xf32> to vector<8x8xf32>
    %c0_26 = arith.constant 0 : index
    %c16 = arith.constant 16 : index
    %63 = vector.load %arg18[%c0_26, %c16] : memref<8x32xf32, #tpu.memory_space<vmem>>, vector<8x8xf32>
    tpu.vector_store %arg18[%c0_26, %c16], %62 {strides = array<i32>} : memref<8x32xf32, #tpu.memory_space<vmem>>, vector<8x8xf32>,
    %64 = vector.extract_strided_slice %54 {offsets = [3, 0, 0], sizes = [1, 8, 8], strides = [1, 1, 1]} : vector<4x8x8xf32> to vector<1x8x8xf32>
    %65 = vector.shape_cast %64 : vector<1x8x8xf32> to vector<8x8xf32>
    %c0_27 = arith.constant 0 : index
    %c24 = arith.constant 24 : index
    %66 = vector.load %arg18[%c0_27, %c24] : memref<8x32xf32, #tpu.memory_space<vmem>>, vector<8x8xf32>
    tpu.vector_store %arg18[%c0_27, %c24], %65 {strides = array<i32>} : memref<8x32xf32, #tpu.memory_space<vmem>>, vector<8x8xf32>,
    %c0_28 = arith.constant 0 : index
    %c0_29 = arith.constant 0 : index
    %67 = vector.load %arg18[%c0_28, %c0_29] : memref<8x32xf32, #tpu.memory_space<vmem>>, vector<8x32xf32>
    %68 = arith.truncf %67 : vector<8x32xf32> to vector<8x32xbf16>
    %c0_30 = arith.constant 0 : index
    %c0_31 = arith.constant 0 : index
    %69 = vector.load %arg8[%c0_30, %c0_31] : memref<32x32xbf16, #tpu.memory_space<vmem>>, vector<32x32xbf16>
    %cst_32 = arith.constant dense<0.000000e+00> : vector<8x32xf32>
    %70 = tpu.matmul %68, %69, %cst_32 {dimension_numbers = #tpu.dot_dimension_numbers<[1], [0], [0], [1], [0, 0, 1, 1], [], []>} : vector<8x32xbf16>, vector<32x32xbf16>, vector<8x32xf32> -> vector<8x32xf32>
    %c0_33 = arith.constant 0 : index
    %c0_34 = arith.constant 0 : index
    %71 = vector.load %arg9[%c0_33, %c0_34] : memref<1x32xf32, #tpu.memory_space<vmem>>, vector<1x32xf32>
    %72 = vector.shape_cast %71 : vector<1x32xf32> to vector<32xf32>
    %73 = vector.shape_cast %72 : vector<32xf32> to vector<1x32xf32>
    %74 = vector.broadcast %73 : vector<1x32xf32> to vector<8x32xf32>
    %75 = arith.addf %70, %74 : vector<8x32xf32>
    %76 = arith.addf %75, %4 : vector<8x32xf32>
    %77 = arith.truncf %76 : vector<8x32xf32> to vector<8x32xbf16>
    %c0_35 = arith.constant 0 : index
    %c0_36 = arith.constant 0 : index
    %78 = vector.load %arg10[%c0_35, %c0_36] : memref<32x64xbf16, #tpu.memory_space<vmem>>, vector<32x64xbf16>
    %cst_37 = arith.constant dense<0.000000e+00> : vector<8x64xf32>
    %79 = tpu.matmul %77, %78, %cst_37 {dimension_numbers = #tpu.dot_dimension_numbers<[1], [0], [0], [1], [0, 0, 1, 1], [], []>} : vector<8x32xbf16>, vector<32x64xbf16>, vector<8x64xf32> -> vector<8x64xf32>
    %c0_38 = arith.constant 0 : index
    %c0_39 = arith.constant 0 : index
    %80 = vector.load %arg11[%c0_38, %c0_39] : memref<1x64xf32, #tpu.memory_space<vmem>>, vector<1x64xf32>
    %81 = vector.shape_cast %80 : vector<1x64xf32> to vector<64xf32>
    %82 = vector.shape_cast %81 : vector<64xf32> to vector<1x64xf32>
    %83 = vector.broadcast %82 : vector<1x64xf32> to vector<8x64xf32>
    %84 = arith.addf %79, %83 : vector<8x64xf32>
    %cst_40 = arith.constant 0.000000e+00 : f32
    %85 = vector.broadcast %cst_40 : f32 to vector<8x64xf32>
    %86 = arith.maximumf %84, %85 : vector<8x64xf32>
    %87 = arith.truncf %86 : vector<8x64xf32> to vector<8x64xbf16>
    %c0_41 = arith.constant 0 : index
    %c0_42 = arith.constant 0 : index
    %88 = vector.load %arg12[%c0_41, %c0_42] : memref<64x32xbf16, #tpu.memory_space<vmem>>, vector<64x32xbf16>
    %cst_43 = arith.constant dense<0.000000e+00> : vector<8x32xf32>
    %89 = tpu.matmul %87, %88, %cst_43 {dimension_numbers = #tpu.dot_dimension_numbers<[1], [0], [0], [1], [0, 0, 1, 1], [], []>} : vector<8x64xbf16>, vector<64x32xbf16>, vector<8x32xf32> -> vector<8x32xf32>
    %c0_44 = arith.constant 0 : index
    %c0_45 = arith.constant 0 : index
    %90 = vector.load %arg13[%c0_44, %c0_45] : memref<1x32xf32, #tpu.memory_space<vmem>>, vector<1x32xf32>
    %91 = vector.shape_cast %90 : vector<1x32xf32> to vector<32xf32>
    %92 = vector.shape_cast %91 : vector<32xf32> to vector<1x32xf32>
    %93 = vector.broadcast %92 : vector<1x32xf32> to vector<8x32xf32>
    %94 = arith.addf %89, %93 : vector<8x32xf32>
    %95 = arith.addf %94, %76 : vector<8x32xf32>
    %c0_46 = arith.constant 0 : index
    %c0_47 = arith.constant 0 : index
    %c0_48 = arith.constant 0 : index
    %96 = vector.load %arg14[%c0_46, %c0_47, %c0_48] : memref<1x8x32xf32, #tpu.memory_space<vmem>>, vector<1x8x32xf32>
    %97 = vector.shape_cast %96 : vector<1x8x32xf32> to vector<8x32xf32>
    %98 = vector.shape_cast %95 : vector<8x32xf32> to vector<1x8x32xf32>
    tpu.vector_store %arg14[%c0_46, %c0_47, %c0_48], %98 {strides = array<i32>} : memref<1x8x32xf32, #tpu.memory_space<vmem>>, vector<1x8x32xf32>,
    return
  }
  func.func @transform_0(%arg0: i32, %arg1: i32) -> (i32, i32, i32) {
    %c0_i32 = arith.constant 0 : i32
    %c0_i32_0 = arith.constant 0 : i32
    return %arg0, %arg1, %c0_i32 : i32, i32, i32
  }
  func.func @transform_1(%arg0: i32, %arg1: i32) -> (i32, i32, i32) {
    %c0_i32 = arith.constant 0 : i32
    %c0_i32_0 = arith.constant 0 : i32
    %c0_i32_1 = arith.constant 0 : i32
    return %arg0, %c0_i32, %c0_i32_0 : i32, i32, i32
  }
  func.func @transform_2(%arg0: i32, %arg1: i32) -> (i32, i32) {
    %c0_i32 = arith.constant 0 : i32
    %c0_i32_0 = arith.constant 0 : i32
    %c0_i32_1 = arith.constant 0 : i32
    return %c0_i32, %c0_i32_0 : i32, i32
  }
  func.func @transform_3(%arg0: i32, %arg1: i32) -> (i32, i32) {
    %c0_i32 = arith.constant 0 : i32
    %c0_i32_0 = arith.constant 0 : i32
    %c0_i32_1 = arith.constant 0 : i32
    return %c0_i32, %c0_i32_0 : i32, i32
  }
  func.func @transform_4(%arg0: i32, %arg1: i32) -> (i32, i32) {
    %c0_i32 = arith.constant 0 : i32
    %c0_i32_0 = arith.constant 0 : i32
    %c0_i32_1 = arith.constant 0 : i32
    return %c0_i32, %c0_i32_0 : i32, i32
  }
  func.func @transform_5(%arg0: i32, %arg1: i32) -> (i32, i32) {
    %c0_i32 = arith.constant 0 : i32
    %c0_i32_0 = arith.constant 0 : i32
    %c0_i32_1 = arith.constant 0 : i32
    return %c0_i32, %c0_i32_0 : i32, i32
  }
  func.func @transform_6(%arg0: i32, %arg1: i32) -> (i32, i32) {
    %c0_i32 = arith.constant 0 : i32
    %c0_i32_0 = arith.constant 0 : i32
    %c0_i32_1 = arith.constant 0 : i32
    return %c0_i32, %c0_i32_0 : i32, i32
  }
  func.func @transform_7(%arg0: i32, %arg1: i32) -> (i32, i32) {
    %c0_i32 = arith.constant 0 : i32
    %c0_i32_0 = arith.constant 0 : i32
    %c0_i32_1 = arith.constant 0 : i32
    return %c0_i32, %c0_i32_0 : i32, i32
  }
  func.func @transform_8(%arg0: i32, %arg1: i32) -> (i32, i32) {
    %c0_i32 = arith.constant 0 : i32
    %c0_i32_0 = arith.constant 0 : i32
    %c0_i32_1 = arith.constant 0 : i32
    return %c0_i32, %c0_i32_0 : i32, i32
  }
  func.func @transform_9(%arg0: i32, %arg1: i32) -> (i32, i32) {
    %c0_i32 = arith.constant 0 : i32
    %c0_i32_0 = arith.constant 0 : i32
    %c0_i32_1 = arith.constant 0 : i32
    return %c0_i32, %c0_i32_0 : i32, i32
  }
  func.func @transform_10(%arg0: i32, %arg1: i32) -> (i32, i32) {
    %c0_i32 = arith.constant 0 : i32
    %c0_i32_0 = arith.constant 0 : i32
    %c0_i32_1 = arith.constant 0 : i32
    return %c0_i32, %c0_i32_0 : i32, i32
  }
  func.func @transform_11(%arg0: i32, %arg1: i32) -> (i32, i32) {
    %c0_i32 = arith.constant 0 : i32
    %c0_i32_0 = arith.constant 0 : i32
    %c0_i32_1 = arith.constant 0 : i32
    return %c0_i32, %c0_i32_0 : i32, i32
  }
  func.func @transform_12(%arg0: i32, %arg1: i32) -> (i32, i32, i32) {
    %c0_i32 = arith.constant 0 : i32
    %c0_i32_0 = arith.constant 0 : i32
    return %arg0, %arg1, %c0_i32 : i32, i32, i32
  }
  func.func @transform_13(%arg0: i32, %arg1: i32) -> (i32, i32, i32, i32) {
    %c0_i32 = arith.constant 0 : i32
    %c0_i32_0 = arith.constant 0 : i32
    %c0_i32_1 = arith.constant 0 : i32
    return %arg0, %c0_i32, %arg1, %c0_i32_0 : i32, i32, i32, i32
  }
}

</mosaic_0001>

<bundles_post_ra>
// kernel: tpu_custom_call.1
= control target key start
LH: loop header
LB: loop body
LE: loop exit
PB: predicated region body
PF: predicated region fallthrough
CT: control target
= control target key end

     0   :  { %s2729_s0 = inlined_call_operand.vmem [shape: f32[2,8,32], index: 0, kind: input, shape index: {}]   ;;  %s2730_s1 = inlined_call_operand.hbm [shape: bf16[2,8,32], index: 1, kind: input, shape index: {}]   ;;  %s2731_s2 = inlined_call_operand.vmem [shape: bf16[32,32], index: 2, kind: input, shape index: {}]   ;;  %s2732_s3 = inlined_call_operand.vmem [shape: f32[1,32], index: 3, kind: input, shape index: {}]   ;;  %s2733_s4 = inlined_call_operand.vmem [shape: bf16[32,64], index: 4, kind: input, shape index: {}]   ;;  %s2734_s5 = inlined_call_operand.vmem [shape: f32[1,64], index: 5, kind: input, shape index: {}]   ;;  %s2735_s6 = inlined_call_operand.hbm [shape: bf16[32,32], index: 6, kind: input, shape index: {}]   ;;  %s2736_s7 = inlined_call_operand.hbm [shape: f32[1,32], index: 7, kind: input, shape index: {}]   ;;  %s2737_s8 = inlined_call_operand.hbm [shape: bf16[32,64], index: 8, kind: input, shape index: {}]   ;;  %s2738_s9 = inlined_call_operand.hbm [shape: f32[1,64], index: 9, kind: input, shape index: {}]   ;;  %s2739_s10 = inlined_call_operand.vmem [shape: bf16[64,32], index: 10, kind: input, shape index: {}]   ;;  %s2740_s11 = inlined_call_operand.vmem [shape: f32[1,32], index: 11, kind: input, shape index: {}]   ;;  %s2741_s12 = inlined_call_operand.hbm [shape: f32[2,8,32], index: 12, kind: output, shape index: {0}]   ;;  %s2742_s13 = inlined_call_operand.hbm [shape: bf16[2,4,8,8], index: 13, kind: output, shape index: {1}]  }
   0x1   :  { %2748 = sst [smem:[#allocation26_spill]] %s2735_s6 }
   0x2   :  { %2749 = sst [smem:[#allocation27_spill]] %s2736_s7 }
   0x3   :  { %2750 = sst [smem:[#allocation28_spill]] %s2737_s8 }
   0x4   :  { %2751 = sst [smem:[#allocation29_spill]] %s2738_s9 }
   0x5   :  { %2752 = sst [smem:[#allocation30_spill]] %s2740_s11 }
   0x6   :  { %2753 = sst [smem:[#allocation31_spill]] %s2741_s12 }
   0x7   :  { %19 = vsyncpa [#allocation6], 0 }
   0x8   :  { %21 = vsyncpa [#allocation6 + $0x1], 0 }
   0x9   :  { %22 = vsyncpa [#allocation9], 0 }
   0xa   :  { %23 = vsyncpa [#allocation12], 0 }
   0xb   :  { %24 = vsyncpa [#allocation7], 0 }
   0xc   :  { %26 = vsyncpa [#allocation7 + $0x1], 0 }
   0xd   :  { %27 = vsyncpa [#allocation16], 0 }
   0xe   :  { %29 = vsyncpa [#allocation16 + $0x1], 0  ;;  %s2339_s25 = smov 0   ;;  %s2341_s26 = smov 0  }
   0xf   :  { %s2343_s27 = smov 0   ;;  %s2345_s28 = smov 0  }
  0x10   :  { %s2347_s29 = smov 0   ;;  %s2349_s30 = smov 0  }
  0x11 LB: > { %2754 = sst [smem:[#allocation22_spill]] %s2224_s25  ;;  %s2743_s14 = sadd.s32 4294967295, %s2244_s30   ;;  %s2244_s30 = sphi %s2349_s30, %s35_s30   ;;  %s2240_s29 = sphi %s2347_s29, %s2778_s29   ;;  %s2236_s28 = sphi %s2345_s28, %s2777_s28   ;;  %s2232_s27 = sphi %s2343_s27, %s2781_s27   ;;  %s2228_s26 = sphi %s2341_s26, %s2780_s26   ;;  %s2224_s25 = sphi %s2339_s25, %s2779_s25  }
  0x12   : > { %2755 = sst [smem:[#allocation23_spill]] %s2240_s29  ;;  %p1660_p0 = scmp.ge.s32.totalorder %s2244_s30, 1 }
  0x13   : > { %p2373_p1 = scmp.eq.s32.totalorder %s2743_s14, 0  ;;  %p372_p2 = scmp.lt.s32.totalorder %s2244_s30, 3 }
  0x14   : > { %s2246_s17 = smov [#allocation8]   ;;  %s2247_s20 = smov [#allocation11]  }
  0x15   : > { %p2378_p3 = pnand %p1660_p0, %p372_p2  ;;  %s396_s18 = sshll.u32 %s2246_s17, 4  ;;  %s397_s18 = int_to_ptr.vmem [resolvable:$true] %s396_s18 }
  0x16   : > { %s420_s21 = sshll.u32 %s2247_s20, 4  ;;  %s2248_s22 = smov [#allocation10]   ;;  %s421_s21 = int_to_ptr.vmem [resolvable:$true] %s420_s21 }
  0x17   : > { %p1864_p4 = pneg %p2378_p3  ;;  %s410_s23 = sshll.u32 %s2248_s22, 4  ;;  %s411_s23 = int_to_ptr.vmem [resolvable:$true] %s410_s23 }
  0x18   : > { %s2005_s24 = scalar_lea.vmem %s397_s18, 256  ;;  %p2013_p11 = scmp.lt.s32.totalorder %s397_s18, %s397_s18 }
  0x19   : > { %p2387_p6 = pnand %p1864_p4, %p2373_p1  ;;  %p2006_p8 = scmp.ne.s32.totalorder %s397_s18, %s2005_s24 }
  0x1a   : > { %p2014_p12 = scmp.lt.s32.totalorder %s2005_s24, %s2005_s24 }
  0x1b   : > { %p1996_p7 = pneg %p2387_p6 }
  0x1c   : > { %p2015_p13 = por %p2014_p12, %p2013_p11 }
  0x1d   : > { %p2008_p9 = pnand %p2006_p8, %p1996_p7 }
  0x1f   : > { %p2009_p10 = pneg %p2008_p9 }
  0x21   : > { %p2016_p0 = pnand %p2015_p13, %p2009_p10 }
  0x23   : > { %2019 = shalt.err (!%p2016_p0)
}
  0x24   : > { %s2249_s17 = smov 64   ;;  %s2250_s20 = smov 4  }
  0x25   : > { %s2759_s6 = sld [smem:[#allocation26_spill]]  ;;  %s2031_s12 = scalar_lea.vmem %s421_s21, 256 }
  0x26   : > { %p2032_p2 = scmp.ne.s32.totalorder %s421_s21, %s2031_s12  ;;  %p2039_p9 = scmp.lt.s32.totalorder %s421_s21, %s421_s21 }
  0x27   : > { %p2040_p5 = scmp.lt.s32.totalorder %s2031_s12, %s2031_s12 }
  0x28   : > { %p2034_p4 = pnand %p2032_p2, %p1996_p7 }
  0x29   : > { %p2041_p11 = por %p2040_p5, %p2039_p9 }
  0x2a   : > { %p2035_p8 = pneg %p2034_p4 }
  0x2b   : > { %1867 = dma.hbm_to_vmem [thread:$0]  (!%p2387_p6), %s2759_s6, 256, %s397_s18, [#allocation9], %s2249_s17, %s2249_s17, %s2250_s20  }
  0x2c   : > { %p2042_p10 = pnand %p2041_p11, %p2035_p8 }
  0x2e   : > { %2045 = shalt.err (!%p2042_p10)
}
  0x2f   : > { %s2760_s8 = sld [smem:[#allocation28_spill]]  ;;  %s2057_s14 = scalar_lea.vmem %s411_s23, 16 }
  0x30   : > { %p2058_p12 = scmp.ne.s32.totalorder %s411_s23, %s2057_s14  ;;  %s2064_s18 = scalar_lea.vmem %s411_s23, 32 }
  0x31   : > { %p2065_p2 = scmp.lt.s32.totalorder %s411_s23, %s411_s23  ;;  %p2066_p4 = scmp.lt.s32.totalorder %s2064_s18, %s2057_s14 }
  0x32   : > { %p2060_p13 = pnand %p2058_p12, %p1996_p7 }
  0x33   : > { %p2067_p5 = por %p2066_p4, %p2065_p2 }
  0x34   : > { %p2061_p0 = pneg %p2060_p13 }
  0x35   : > { %1873 = dma.hbm_to_vmem [thread:$0]  (!%p2387_p6), %s2760_s8, 256, %s421_s21, [#allocation12], %s2249_s17, %s2249_s17, %s2250_s20  }
  0x36   : > { %p2068_p8 = pnand %p2067_p5, %p2061_p0 }
  0x38   : > { %2071 = shalt.err (!%p2068_p8)
}
  0x39   : > { %s2761_s7 = sld [smem:[#allocation27_spill]]  ;;  %s2251_s11 = smov [#allocation13]  }
  0x3a   : > { %s434_s21 = sshll.u32 %s2251_s11, 4  ;;  %s435_s21 = int_to_ptr.vmem [resolvable:$true] %s434_s21 }
  0x3b   : > { %s2083_s17 = scalar_lea.vmem %s435_s21, 16  ;;  %s2090_s20 = scalar_lea.vmem %s435_s21, 32 }
  0x3c   : > { %p2084_p9 = scmp.ne.s32.totalorder %s435_s21, %s2083_s17  ;;  %p2091_p12 = scmp.lt.s32.totalorder %s435_s21, %s435_s21 }
  0x3d   : > { %p2092_p13 = scmp.lt.s32.totalorder %s2090_s20, %s2083_s17 }
  0x3e   : > { %p2086_p11 = pnand %p2084_p9, %p1996_p7 }
  0x3f   : > { %1870 = dma.hbm_to_vmem [thread:$0]  (!%p2387_p6), %s2761_s7, 16, %s411_s23, [#allocation9]  }
  0x40   : > { %p2087_p10 = pneg %p2086_p11  ;;  %p2093_p0 = por %p2092_p13, %p2091_p12 }
  0x42   : > { %p2094_p2 = pnand %p2093_p0, %p2087_p10 }
  0x44   : > { %2097 = shalt.err (!%p2094_p2)
}
  0x45   : > { %s2762_s9 = sld [smem:[#allocation29_spill]]  ;;  %s1659_s23 = sadd.s32 4294967294, %s2244_s30  }
  0x46   : > { %s47_s18 = sadd.s32 1, %s2240_s29  ;;  %s82_s19 = sadd.s32 1, %s2232_s27 }
  0x47   : > { %p49_p7 = scmp.ge.s32.totalorder %s47_s18, 2  ;;  %p89_p4 = scmp.ne.s32.totalorder %s2232_s27, %s2228_s26 }
  0x48   : > { %p90_p5 = scmp.eq.s32.totalorder %s2244_s30, 0  ;;  %p95_p9 = scmp.ne.s32.totalorder %s2228_s26, %s2224_s25 }
  0x49   : > { %s2783_s18 = smov (%p49_p7, %s47_s18), 0  ;;  %s2765_s11 = sadd.s32 4294967295, %s2244_s30  }
  0x4a   : > { %2763 = sst [smem:[#allocation24_spill]] %s2783_s18  ;;  %p2433_p8 = por %p90_p5, %p89_p4 }
  0x4b   : > { %1876 = dma.hbm_to_vmem [thread:$0]  (!%p2387_p6), %s2762_s9, 16, %s435_s21, [#allocation12]  }
  0x4c   : > { %s79_s22 = ssub.s32 %s2240_s29, %s2783_s18  ;;  %p331_p6 = scmp.eq.s32.totalorder %s2765_s11, 1 }
  0x4d   : > { %p80_p11 = scmp.eq.s32.totalorder %s79_s22, 0  ;;  %p2445_p10 = por %p2373_p1, %p95_p9 }
  0x4e   : > { %p2449_p12 = por %p331_p6, %p89_p4  ;;  %p337_p13 = scmp.eq.s32.totalorder %s1659_s23, 1 }
  0x4f   : > { %s2454_s20 = scalar_select %p80_p11, %s2232_s27, %s82_s19  }
  0x50   : > { %p2456_p0 = por %p337_p13, %p95_p9  ;;  %p1892_p2 = scmp.lt.s32.totalorder %s2244_s30, 2 }
  0x51   : > { %2768 = sst [smem:[#allocation25_spill]] %s2454_s20  ;;  %s461_s14 = sand.u32 1, %s2232_s27  }
  0x52   : > { %s2769_s24 = scalar_select %p2456_p0, 1, 0 }
  0x53   : > { %s1667_s11 = sshll.u32 %s2240_s29, 6  ;;  %s1666_s22 = sshll.u32 %s461_s14, 2 }
  0x54   : > { %s470_s8 = scalar_lea.hbm %s2730_s1, %s1667_s11  ;;  %s465_s9 = scalar_lea.vmem [#allocation5], %s1666_s22 }
  0x55   : > { %s472_s18 = sshll.u32 %s465_s9, 4  ;;  %p2468_p7 = pnand %p1892_p2, %p2433_p8  ;;  %s473_s18 = int_to_ptr.vmem [resolvable:$true] %s472_s18 }
  0x56   : > { %s462_s23 = scalar_lea.sflag [#allocation6], %s461_s14  ;;  %s2111_s19 = scalar_lea.vmem %s473_s18, 64 }
  0x57   : > { %p2100_p4 = pneg %p2468_p7  ;;  %p2112_p5 = scmp.ne.s32.totalorder %s473_s18, %s2111_s19 }
  0x58   : > { %s2252_s29 = smov [#allocation5]  }
  0x59   : > { %p2114_p9 = pnand %p2112_p5, %p2100_p4  ;;  %s2116_s20 = sshll.u32 %s2252_s29, 4  ;;  %s2117_s20 = int_to_ptr.vmem [resolvable:$false] %s2116_s20 }
  0x5a   : > { %s2118_s6 = scalar_lea.vmem %s2117_s20, 128  ;;  %p2119_p11 = scmp.lt.s32.totalorder %s473_s18, %s2117_s20 }
  0x5b   : > { %p2115_p6 = pneg %p2114_p9  ;;  %p2120_p13 = scmp.lt.s32.totalorder %s2118_s6, %s2111_s19 }
  0x5d   : > { %p2121_p0 = por %p2120_p13, %p2119_p11 }
  0x5f   : > { %p2122_p8 = pnand %p2121_p0, %p2115_p6 }
  0x61   : > { %2125 = shalt.err (!%p2122_p8)
}
  0x62   : > { %1880 = dma.hbm_to_vmem [thread:$0]  (!%p2468_p7), %s470_s8, 64, %s473_s18, %s462_s23  }
  0x63   : > { %481 = sbr.rel (%p2378_p3) target bundleno = 1902 (0x76e), region = 68  ;;  %s2479_s7 = sand.u32 (!%p2378_p3), 1, %s2228_s26  }
  0x64   : > { %s1669_s9 = sshll.u32 (!%p2378_p3), %s2479_s7, 2  ;;  %s484_s29 = scalar_lea.sflag (!%p2378_p3), [#allocation6], %s2479_s7 }
  0x65   : > { %s487_s12 = scalar_lea.vmem (!%p2378_p3), [#allocation5], %s1669_s9 }
  0x68   : > { %2203 = dma.done.wait (%p2445_p10), %s484_s29, 64  }
  0x69   : > { %2205 = vsyncadd (%p2445_p10), %s484_s29, 4294967232 }
  0x6a   : > { %2207 = dma.done.wait (%p2373_p1), [#allocation9], 272  }
  0x6b   : > { %2209 = vsyncadd (%p2373_p1), [#allocation9], 4294967024 }
  0x6c   : > { %2211 = dma.done.wait (%p2373_p1), [#allocation12], 272  }
  0x6d   : > { %2213 = vsyncadd (%p2373_p1), [#allocation12], 4294967024  ;;  %v2253_v0 = vmov 0.0   ;;  %vm2254_vm0 = vmmov 0   ;;  %p558_p3 = scmp.lt.s32.totalorder %s2236_s28, 1  ;;  %v1966_v1 = vld [vmem:[%s2733_s4 + $0x8] sm:$0xff]   ;;  %v770_v39 = vlaneseq }
  0x6e   : > { %1750 = vmatprep.subr.bf16.mxu1 %v2253_v0  ;;  %1754 = vmatprep.mubr.msk.bf16.mxu1 %vm2254_vm0, %v2253_v0  ;;  %v1967_v2 = vld [vmem:[%s2733_s4] sm:$0xff]   ;;  %v570_v3 = vld [vmem:[%s487_s12] sm:$0xf]  ;;  %vm594_vm1 = vcmask 261120   ;;  %vm639_vm2 = vcmask 60416   ;;  %s2255_s12 = smov 104  }
  0x6f   : > { %1766 = vmatprep.subr.bf16.mxu0 %v2253_v0  ;;  %1768 = vmatprep.mubr.msk.bf16.mxu0 %vm2254_vm0, %v2253_v0  ;;  %s559_s15 = scalar_select %p558_p3, %s2236_s28, 1  ;;  %v1968_v4 = vld [vmem:[%s2731_s2 + $0x8] sm:$0xff]   ;;  %v1969_v5 = vld [vmem:[%s2731_s2] sm:$0xff]   ;;  %vm778_vm3 = vcmask 64512   ;;  %v771_v40 = vshrl.u32 %v770_v39, 7  ;;  %v775_v41 = vand.u32 127, %v770_v39 }
  0x70   : > { %1751 = vmatpush3.bf16.msra.mxu1 %v1966_v1  ;;  %v1677_v8 = vld [vmem:[%s2734_s5] ss:$0 sm:$0xff]  ;;  %s2256_s8 = smov 120   ;;  %s2257_s16 = smov 112   ;;  %vm1031_vm5 = vcmask 1043456   ;;  %vm1218_vm6 = vcmask 130112  }
  0x71   : > { %1752 = vmatprep.subr.bf16.mxu1 %v2253_v0  ;;  %s1676_s14 = sshll.u32 %s559_s15, 3  ;;  %v1682_v15 = vld [vmem:[%s2732_s3] ss:$0 sm:$0xff]  ;;  %vm776_vm4 = vcmp.gt.s32.totalorder %v775_v41, %v771_v40  ;;  %s2258_s18 = smov 96   ;;  %vm1224_vm7 = vcmask 195712   ;;  %vm1230_vm8 = vcmask 261312  }
  0x72   : > { %s564_s23 = scalar_lea.vmem %s2729_s0, %s1676_s14  ;;  %v777_v42 = vsel %vm776_vm4, -1e+30, %v2253_v0  ;;  %s2259_s21 = smov 80   ;;  %vm1409_vm9 = vcmask 523264  }
  0x73   : > { %v2523_v6 = vld [vmem:[%s564_s23] sm:$0xff]  ;;  %s2260_s20 = smov 72   ;;  %s2261_s14 = smov 88  }
  0x74   : > { %1753 = vmatpush3.bf16.msra.mxu1 %v1967_v2  ;;  %v679_v7 = vpack.c.bf16 %v2523_v6, %v2523_v6  ;;  %s1675_s11 = sshll.u32 %s2479_s7, 4  ;;  %s2262_s23 = smov 16  }
  0x75   : > { %1758 = vmatprep.subr.bf16.mxu1 %v2253_v0  ;;  %s2585_s22 = scalar_lea.vmem [#allocation15], %s1675_s11  ;;  %s2263_s19 = smov 8  }
  0x76   : > { %s2264_s6 = smov 24   ;;  %s2265_s9 = smov [#allocation15]  }
  0x77   : > { %1755 = vmatmul.mubr.msk.bf16.vlgmr.msra.gmra.mxu1 %vm594_vm1, %v570_v3  ;;  %s2130_s29 = sshll.u32 %s2265_s9, 4  ;;  %s2131_s29 = int_to_ptr.vmem [resolvable:$false] %s2130_s29 }
  0x78   : > { %1759 = vmatpush3.bf16.msra.mxu1 %v1968_v4  ;;  %1762 = vmatprep.mubr.msk.bf16.mxu1 %vm2254_vm0, %v2253_v0 }
  0x79   : > { %1760 = vmatprep.subr.bf16.mxu1 %v2253_v0 }
  0x7c   : > { %1761 = vmatpush3.bf16.msra.mxu1 %v1969_v5 }
  0x7d   : > { %1772 = vmatprep.subr.bf16.mxu1 %v2253_v0 }
  0x7f   : > { %1763 = vmatmul.mubr.msk.bf16.vlgmr.msra.gmra.mxu1 %vm594_vm1, %v679_v7 }
  0x80   : > { %1774 = vmatprep.mubr.msk.bf16.mxu1 %vm2254_vm0, %v2253_v0 }
 0x137   : > { %v632_v9 = vpop.f32.mrf.mxu1 }
 0x138   : > { %v633_v10 = vadd.f32 %v1677_v8, %v632_v9 }
 0x139   : > { %v1756_v11 = vpop.f32.mrf.mxu1 }
 0x13a   : > { %v2535_v12 = vpack.c.bf16 %v633_v10, %v633_v10 }
 0x13b   : > { %v635_v13 = vpop.f32.mrf.mxu1 }
 0x13c   : > { %640 = vst.msk [vmem:[#allocation2] sm:$0xf] %vm639_vm2, %v2535_v12  ;;  %668 = vrot.lane.b32.xlu1 %v2535_v12, %s2255_s12  ;;  %648 = vrot.lane.b32.xlu0 %v2535_v12, %s2256_s8 }
 0x13d   : > { %v1757_v14 = vpop.f32.mrf.mxu1 }
 0x13f   : > { %v741_v16 = vpop.f32.mrf.mxu1 }
 0x140   : > { %658 = vrot.lane.b32.xlu0 %v2535_v12, %s2257_s16  ;;  %v742_v17 = vadd.f32 %v1682_v15, %v741_v16 }
 0x141   : > { %v1764_v18 = vpop.f32.mrf.mxu1 }
 0x142   : > { %748 = vrot.lane.b32.xlu1 %v742_v17, %s2256_s8  ;;  %v757_v23 = vpack.c.bf16 %v742_v17, %v742_v17 }
 0x143   : > { %v744_v19 = vpop.f32.mrf.mxu1  ;;  %v761_v20 = vld [vmem:[#allocation2] sm:$0xf] }
 0x144   : > { %v783_v21 = vsel %vm778_vm3, %v761_v20, 0  ;;  %751 = vrot.lane.b32.xlu0 %v742_v17, %s2257_s16 }
 0x145   : > { %1767 = vmatpush3.bf16.xpose.msra.mxu0 %v783_v21  ;;  %v1765_v22 = vpop.f32.mrf.mxu1 }
 0x146   : > { %754 = vrot.lane.b32.xlu1 %v742_v17, %s2255_s12  ;;  %1778 = vmatprep.subr.bf16.mxu0 %v2253_v0 }
 0x14c   : > { %1769 = vmatmul.mubr.msk.bf16.vlgmr.msra.gmra.mxu0 %vm778_vm3, %v757_v23 }
 0x14d   : > { %1780 = vmatprep.mubr.msk.bf16.mxu0 %vm2254_vm0, %v2253_v0 }
 0x1ae   : > { %v669_v24 = vpop.permute.xlu1 %668  ;;  %v649_v25 = vpop.permute.xlu0 %648 }
 0x1af   : > { %672 = vst.msk [vmem:[#allocation2 + $0xc] sm:$0xf] %vm639_vm2, %v669_v24  ;;  %652 = vst.msk [vmem:[#allocation2 + $0x4] sm:$0xf] %vm639_vm2, %v649_v25 }
 0x1b2   : > { %v659_v26 = vpop.permute.xlu0 %658 }
 0x1b3   : > { %662 = vst.msk [vmem:[#allocation2 + $0x8] sm:$0xf] %vm639_vm2, %v659_v26 }
 0x1b4   : > { %v749_v29 = vpop.permute.xlu1 %748 }
 0x1b5   : > { %v758_v31 = vpack.c.bf16 %v749_v29, %v749_v29 }
 0x1b6   : > { %v762_v27 = vld [vmem:[#allocation2 + $0x4] sm:$0xf]  ;;  %v764_v33 = vld [vmem:[#allocation2 + $0xc] sm:$0xf]  ;;  %v752_v34 = vpop.permute.xlu0 %751 }
 0x1b7   : > { %v829_v28 = vsel %vm778_vm3, %v762_v27, 0  ;;  %v921_v35 = vsel %vm778_vm3, %v764_v33, 0  ;;  %v759_v36 = vpack.c.bf16 %v752_v34, %v752_v34 }
 0x1b8   : > { %1773 = vmatpush3.bf16.xpose.msra.mxu1 %v829_v28  ;;  %v755_v37 = vpop.permute.xlu1 %754 }
 0x1b9   : > { %1784 = vmatprep.subr.bf16.mxu1 %v2253_v0  ;;  %v760_v38 = vpack.c.bf16 %v755_v37, %v755_v37 }
 0x1ba   : > { %v763_v30 = vld [vmem:[#allocation2 + $0x8] sm:$0xf] }
 0x1bb   : > { %v875_v32 = vsel %vm778_vm3, %v763_v30, 0 }
 0x1bc   : > { %1779 = vmatpush3.bf16.xpose.msra.mxu0 %v875_v32 }
 0x1bd   : > { %1790 = vmatprep.subr.bf16.mxu0 %v2253_v0 }
 0x1bf   : > { %1775 = vmatmul.mubr.msk.bf16.vlgmr.msra.gmra.mxu1 %vm778_vm3, %v758_v31 }
 0x1c0   : > { %1785 = vmatpush3.bf16.xpose.msra.mxu1 %v921_v35  ;;  %1786 = vmatprep.mubr.msk.bf16.mxu1 %vm2254_vm0, %v2253_v0 }
 0x1c1   : > { %1796 = vmatprep.subr.bf16.mxu1 %v2253_v0 }
 0x1c3   : > { %1781 = vmatmul.mubr.msk.bf16.vlgmr.msra.gmra.mxu0 %vm778_vm3, %v759_v36 }
 0x1c4   : > { %1792 = vmatprep.mubr.msk.bf16.mxu0 %vm2254_vm0, %v2253_v0 }
 0x1c7   : > { %1787 = vmatmul.mubr.msk.bf16.vlgmr.msra.gmra.mxu1 %vm778_vm3, %v760_v38 }
 0x1c8   : > { %1798 = vmatprep.mubr.msk.bf16.mxu1 %vm2254_vm0, %v2253_v0 }
 0x20c   : > { %v819_v43 = vpop.f32.mrf.mxu0 }
 0x20d   : > { %v820_v44 = vadd.f32 %v819_v43, %v777_v42 }
 0x20e   : > { %v1770_v45 = vpop.f32.mrf.mxu0 }
 0x20f   : > { %v963_v46 = vsel %vm778_vm3, %v820_v44, -inf }
 0x210   : > { %964 = vmax.xlane.f32.xlu0 %v963_v46  ;;  %v822_v47 = vpop.f32.mrf.mxu0 }
 0x212   : > { %v1771_v48 = vpop.f32.mrf.mxu0 }
 0x27f   : > { %v865_v49 = vpop.f32.mrf.mxu1 }
 0x280   : > { %v866_v50 = vadd.f32 %v865_v49, %v777_v42 }
 0x281   : > { %v1776_v51 = vpop.f32.mrf.mxu1 }
 0x282   : > { %v966_v52 = vsel %vm778_vm3, %v866_v50, -inf }
 0x283   : > { %v911_v53 = vpop.f32.mrf.mxu0  ;;  %967 = vmax.xlane.f32.xlu1 %v966_v52  ;;  %v868_v54 = vpop.f32.mrf.mxu1 }
 0x284   : > { %v912_v55 = vadd.f32 %v911_v53, %v777_v42 }
 0x285   : > { %v1777_v56 = vpop.f32.mrf.mxu1  ;;  %v1782_v57 = vpop.f32.mrf.mxu0 }
 0x286   : > { %v969_v58 = vsel %vm778_vm3, %v912_v55, -inf }
 0x287   : > { %970 = vmax.xlane.f32.xlu0 %v969_v58  ;;  %v914_v59 = vpop.f32.mrf.mxu0  ;;  %v957_v60 = vpop.f32.mrf.mxu1 }
 0x288   : > { %v958_v61 = vadd.f32 %v957_v60, %v777_v42 }
 0x289   : > { %v1783_v62 = vpop.f32.mrf.mxu0  ;;  %v1788_v63 = vpop.f32.mrf.mxu1 }
 0x28a   : > { %v972_v1 = vsel %vm778_vm3, %v958_v61, -inf }
 0x28b   : > { %973 = vmax.xlane.f32.xlu0 %v972_v1  ;;  %v960_v2 = vpop.f32.mrf.mxu1 }
 0x28c   : > { %v1970_v2 = vld [vmem:[#allocation8 + $0x8] sm:$0xff]  }
 0x28d   : > { %v1789_v3 = vpop.f32.mrf.mxu1 }
 0x294   : > { %644 = vrot.lane.b32.xlu1 %v2535_v12, %s2258_s18 }
 0x299   : > { %v965_v4 = vpop.xlane.xlu0 %964 }
 0x29a   : > { %v975_v5 = vsub.f32 %v820_v44, %v965_v4  ;;  %v1971_v4 = vld [vmem:[#allocation8] sm:$0xff]  }
 0x29c   : > { %v979_v7 = vpack.c.bf16 %v975_v5, %v975_v5 }
 0x29e   : > { %v984_v8 = vmul.bf16 1069105081, %v979_v7 }
 0x2a0   : > { %1978 = vpow.bf16 %v984_v8 }
 0x2ae   : > { %v1979_v9 = vpop.eup %1978 }
 0x2af   : > { %v995_v10 = vunpack.c.l.bf16 %v1979_v9 }
 0x2b1   : > { %v999_v11 = vsel %vm778_vm3, %v995_v10, 0.0 }
 0x2b8   : > { %1000 = vadd.xlane.f32.xlu1 %v999_v11 }
 0x30c   : > { %v968_v13 = vpop.xlane.xlu1 %967 }
 0x30d   : > { %v976_v14 = vsub.f32 %v866_v50, %v968_v13 }
 0x30f   : > { %v980_v15 = vpack.c.bf16 %v976_v14, %v976_v14 }
 0x310   : > { %v971_v16 = vpop.xlane.xlu0 %970  ;;  %v645_v17 = vpop.permute.xlu1 %644 }
 0x311   : > { %v987_v18 = vmul.bf16 1069105081, %v980_v15  ;;  %v977_v19 = vsub.f32 %v912_v55, %v971_v16  ;;  %647 = vst.msk [vmem:[#allocation3] sm:$0xf] %vm639_vm2, %v645_v17 }
 0x313   : > { %1980 = vpow.bf16 %v987_v18  ;;  %v981_v20 = vpack.c.bf16 %v977_v19, %v977_v19 }
 0x314   : > { %v974_v21 = vpop.xlane.xlu0 %973 }
 0x315   : > { %v990_v22 = vmul.bf16 1069105081, %v981_v20  ;;  %v978_v23 = vsub.f32 %v958_v61, %v974_v21 }
 0x317   : > { %1982 = vpow.bf16 %v990_v22  ;;  %v982_v24 = vpack.c.bf16 %v978_v23, %v978_v23  ;;  %v1972_v23 = vld [vmem:[#allocation11 + $0x8] sm:$0xff]  }
 0x318   : > { %v765_v25 = vld [vmem:[#allocation3] sm:$0xf] }
 0x319   : > { %v993_v26 = vmul.bf16 1069105081, %v982_v24  ;;  %v1033_v27 = vsel %vm1031_vm5, %v765_v25, 0  ;;  %v1973_v24 = vld [vmem:[#allocation11] sm:$0xff]   ;;  %v1974_v25 = vld [vmem:[%s2739_s10 + $0x18] sm:$0xff]  }
 0x31a   : > { %1791 = vmatpush3.bf16.msra.mxu0 %v1033_v27  ;;  %v1694_v27 = vld [vmem:[#allocation10] ss:$0 sm:$0xff] }
 0x31b   : > { %1984 = vpow.bf16 %v993_v26  ;;  %1802 = vmatprep.subr.bf16.mxu0 %v2253_v0  ;;  %v1975_v26 = vld [vmem:[%s2739_s10 + $0x10] sm:$0xff]  }
 0x321   : > { %v1981_v28 = vpop.eup %1980 }
 0x322   : > { %v996_v29 = vunpack.c.l.bf16 %v1981_v28 }
 0x324   : > { %v1002_v30 = vsel %vm778_vm3, %v996_v29, 0.0 }
 0x325   : > { %v1983_v31 = vpop.eup %1982  ;;  %1003 = vadd.xlane.f32.xlu0 %v1002_v30 }
 0x326   : > { %v997_v32 = vunpack.c.l.bf16 %v1983_v31 }
 0x328   : > { %v1005_v33 = vsel %vm778_vm3, %v997_v32, 0.0 }
 0x329   : > { %v1985_v34 = vpop.eup %1984  ;;  %1006 = vadd.xlane.f32.xlu1 %v1005_v33 }
 0x32a   : > { %v998_v35 = vunpack.c.l.bf16 %v1985_v34 }
 0x32c   : > { %v1008_v36 = vsel %vm778_vm3, %v998_v35, 0.0  ;;  %v1976_v35 = vld [vmem:[%s2739_s10 + $0x8] sm:$0xff]  }
 0x32d   : > { %1009 = vadd.xlane.f32.xlu0 %v1008_v36  ;;  %v1977_v36 = vld [vmem:[%s2739_s10] sm:$0xff]  }
 0x33a   : > { %663 = vrot.lane.b32.xlu1 %v2535_v12, %s2259_s21  ;;  %s1716_s21 = sshll.u32 %s2236_s28, 8 }
 0x33e   : > { %673 = vrot.lane.b32.xlu1 %v2535_v12, %s2260_s20  ;;  %s1489_s20 = sshll.u32 %s2585_s22, 4  ;;  %s2647_s20 = int_to_ptr.vmem [resolvable:$true] %s1489_s20 }
 0x33f   : > { %p2133_p2 = scmp.lt.s32.totalorder %s2647_s20, %s2131_s29 }
 0x341   : > { %v1001_v37 = vpop.xlane.xlu1 %1000 }
 0x342   : > { %1986 = vrcp.f32 %v1001_v37 }
 0x343   : > { %653 = vrot.lane.b32.xlu0 %v2535_v12, %s2261_s14 }
 0x34f   : > { %v1987_v38 = vpop.eup %1986 }
 0x350   : > { %v1015_v39 = vpack.c.bf16 %v1987_v38, %v1987_v38 }
 0x352   : > { %v1019_v40 = vmul.bf16 %v1979_v9, %v1015_v39 }
 0x354   : > { %1024 = vst.msk [vmem:[%s2585_s22] sm:$0xf] %vm639_vm2, %v1019_v40  ;;  %1793 = vmatmul.mubr.msk.bf16.vlgmr.msra.gmra.mxu0 %vm778_vm3, %v1019_v40 }
 0x355   : > { %1804 = vmatprep.mubr.msk.bf16.mxu0 %vm2254_vm0, %v2253_v0 }
 0x3ae   : > { %v1004_v41 = vpop.xlane.xlu0 %1003 }
 0x3af   : > { %1988 = vrcp.f32 %v1004_v41 }
 0x3b2   : > { %v1007_v42 = vpop.xlane.xlu1 %1006 }
 0x3b3   : > { %1990 = vrcp.f32 %v1007_v42 }
 0x3b6   : > { %v664_v12 = vpop.permute.xlu1 %663  ;;  %v1010_v43 = vpop.xlane.xlu0 %1009 }
 0x3b7   : > { %667 = vst.msk [vmem:[#allocation3 + $0x8] sm:$0xf] %vm639_vm2, %v664_v12  ;;  %1992 = vrcp.f32 %v1010_v43 }
 0x3ba   : > { %v674_v44 = vpop.permute.xlu1 %673  ;;  %v654_v45 = vpop.permute.xlu0 %653 }
 0x3bb   : > { %677 = vst.msk [vmem:[#allocation3 + $0xc] sm:$0xf] %vm639_vm2, %v674_v44  ;;  %657 = vst.msk [vmem:[#allocation3 + $0x4] sm:$0xf] %vm639_vm2, %v654_v45 }
 0x3bc   : > { %v1989_v46 = vpop.eup %1988 }
 0x3bd   : > { %v1016_v47 = vpack.c.bf16 %v1989_v46, %v1989_v46 }
 0x3be   : > { %v767_v48 = vld [vmem:[#allocation3 + $0x8] sm:$0xf] }
 0x3bf   : > { %v1020_v49 = vmul.bf16 %v1981_v28, %v1016_v47  ;;  %v1125_v50 = vsel %vm1031_vm5, %v767_v48, 0 }
 0x3c0   : > { %v1991_v51 = vpop.eup %1990  ;;  %1803 = vmatpush3.bf16.msra.mxu0 %v1125_v50 }
 0x3c1   : > { %1025 = vst.msk [vmem:[%s2585_s22 + $0x4] sm:$0xf] %vm639_vm2, %v1020_v49  ;;  %v1017_v52 = vpack.c.bf16 %v1991_v51, %v1991_v51  ;;  %1814 = vmatprep.subr.bf16.mxu0 %v2253_v0 }
 0x3c2   : > { %v766_v53 = vld [vmem:[#allocation3 + $0x4] sm:$0xf]  ;;  %v768_v57 = vld [vmem:[#allocation3 + $0xc] sm:$0xf] }
 0x3c3   : > { %v1021_v54 = vmul.bf16 %v1983_v31, %v1017_v52  ;;  %v1079_v55 = vsel %vm1031_vm5, %v766_v53, 0  ;;  %v1171_v60 = vsel %vm1031_vm5, %v768_v57, 0 }
 0x3c4   : > { %v1993_v56 = vpop.eup %1992  ;;  %1797 = vmatpush3.bf16.msra.mxu1 %v1079_v55 }
 0x3c5   : > { %1026 = vst.msk [vmem:[%s2585_s22 + $0x8] sm:$0xf] %vm639_vm2, %v1021_v54  ;;  %v1018_v58 = vpack.c.bf16 %v1993_v56, %v1993_v56  ;;  %1805 = vmatmul.mubr.msk.bf16.vlgmr.msra.gmra.mxu0 %vm778_vm3, %v1021_v54  ;;  %1808 = vmatprep.subr.bf16.mxu1 %v2253_v0 }
 0x3c6   : > { %1818 = vmatprep.mubr.msk.bf16.mxu0 %vm2254_vm0, %v2253_v0  ;;  %1815 = vmatpush3.bf16.msra.mxu0 %v1970_v2 }
 0x3c7   : > { %v1022_v59 = vmul.bf16 %v1985_v34, %v1018_v58  ;;  %1799 = vmatmul.mubr.msk.bf16.vlgmr.msra.gmra.mxu1 %vm778_vm3, %v1020_v49  ;;  %1816 = vmatprep.subr.bf16.mxu0 %v2253_v0 }
 0x3c8   : > { %1809 = vmatpush3.bf16.msra.mxu1 %v1171_v60  ;;  %1810 = vmatprep.mubr.msk.bf16.mxu1 %vm2254_vm0, %v2253_v0 }
 0x3c9   : > { %1027 = vst.msk [vmem:[%s2585_s22 + $0xc] sm:$0xf] %vm639_vm2, %v1022_v59  ;;  %1822 = vmatprep.subr.bf16.mxu1 %v2253_v0  ;;  %s2132_s22 = scalar_lea.vmem %s2131_s29, 512 }
 0x3ca   : > { %1817 = vmatpush3.bf16.msra.mxu0 %v1971_v4 }
 0x3cb   : > { %1830 = vmatprep.subr.bf16.mxu0 %v2253_v0 }
 0x3cf   : > { %1811 = vmatmul.mubr.msk.bf16.vlgmr.msra.gmra.mxu1 %vm778_vm3, %v1022_v59 }
 0x3d0   : > { %1826 = vmatprep.mubr.msk.bf16.mxu1 %vm2254_vm0, %v2253_v0  ;;  %1823 = vmatpush3.bf16.msra.mxu1 %v1972_v23 }
 0x3d1   : > { %1824 = vmatprep.subr.bf16.mxu1 %v2253_v0 }
 0x3d4   : > { %1825 = vmatpush3.bf16.msra.mxu1 %v1973_v24 }
 0x414   : > { %v1069_v61 = vpop.f32.mrf.mxu0 }
 0x415   : > { %1213 = vst.msk [vmem:[#allocation4] sm:$0xff] %vm778_vm3, %v1069_v61 }
 0x416   : > { %v1794_v62 = vpop.f32.mrf.mxu0 }
 0x418   : > { %v1072_v63 = vpop.f32.mrf.mxu0 }
 0x41a   : > { %v1795_v1 = vpop.f32.mrf.mxu0 }
 0x485   : > { %v1161_v3 = vpop.f32.mrf.mxu0 }
 0x486   : > { %1221 = vrot.lane.b32.xlu1 %v1161_v3, %s2262_s23  ;;  %s2645_s23 = scalar_lea.hbm %s2742_s13, %s1716_s21 }
 0x487   : > { %v1115_v5 = vpop.f32.mrf.mxu1  ;;  %v1806_v7 = vpop.f32.mrf.mxu0 }
 0x488   : > { %1215 = vrot.lane.b32.xlu0 %v1115_v5, %s2263_s19  ;;  %s1461_s19 = scalar_lea.sflag [#allocation16], %s2479_s7 }
 0x489   : > { %v1800_v8 = vpop.f32.mrf.mxu1  ;;  %v1164_v9 = vpop.f32.mrf.mxu0 }
 0x48b   : > { %v1118_v10 = vpop.f32.mrf.mxu1  ;;  %v1807_v11 = vpop.f32.mrf.mxu0 }
 0x48d   : > { %v1801_v13 = vpop.f32.mrf.mxu1 }
 0x48f   : > { %v1207_v14 = vpop.f32.mrf.mxu1 }
 0x490   : > { %1227 = vrot.lane.b32.xlu0 %v1207_v14, %s2264_s6  ;;  %s2126_s6 = scalar_lea.vmem %s2647_s20, 256 }
 0x491   : > { %v1812_v15 = vpop.f32.mrf.mxu1  ;;  %p2127_p1 = scmp.ne.s32.totalorder %s2647_s20, %s2126_s6  ;;  %p2134_p7 = scmp.lt.s32.totalorder %s2132_s22, %s2126_s6 }
 0x493   : > { %v1210_v16 = vpop.f32.mrf.mxu1  ;;  %p2128_p10 = pnand %p2127_p1, %p2449_p12  ;;  %p2135_p4 = por %p2134_p7, %p2133_p2 }
 0x495   : > { %v1813_v17 = vpop.f32.mrf.mxu1  ;;  %p2129_p0 = pneg %p2128_p10 }
 0x497   : > { %p2136_p5 = pnand %p2135_p4, %p2129_p0 }
 0x4f8   : > { %v1222_v19 = vpop.permute.xlu1 %1221 }
 0x4fa   : > { %v1216_v18 = vpop.permute.xlu0 %1215 }
 0x4fb   : > { %1219 = vst.msk [vmem:[#allocation4] sm:$0xff] %vm1218_vm6, %v1216_v18 }
 0x4fc   : > { %1225 = vst.msk [vmem:[#allocation4] sm:$0xff] %vm1224_vm7, %v1222_v19 }
 0x502   : > { %v1228_v20 = vpop.permute.xlu0 %1227 }
 0x503   : > { %1231 = vst.msk [vmem:[#allocation4] sm:$0xff] %vm1230_vm8, %v1228_v20 }
 0x50a   : > { %v1232_v21 = vld [vmem:[#allocation4] sm:$0xff] }
 0x50b   : > { %v1233_v22 = vpack.c.bf16 %v1232_v21, %v1232_v21 }
 0x50d   : > { %1819 = vmatmul.mubr.msk.bf16.vlgmr.msra.gmra.mxu0 %vm594_vm1, %v1233_v22 }
 0x50e   : > { %1838 = vmatprep.mubr.msk.bf16.mxu0 %vm2254_vm0, %v2253_v0  ;;  %1831 = vmatpush3.bf16.msra.mxu0 %v1974_v25 }
 0x50f   : > { %1832 = vmatprep.subr.bf16.mxu0 %v2253_v0 }
 0x512   : > { %1833 = vmatpush3.bf16.msra.mxu0 %v1975_v26 }
 0x513   : > { %1834 = vmatprep.subr.bf16.mxu0 %v2253_v0 }
 0x516   : > { %1835 = vmatpush3.bf16.msra.mxu0 %v1976_v35 }
 0x517   : > { %1836 = vmatprep.subr.bf16.mxu0 %v2253_v0 }
 0x51a   : > { %1837 = vmatpush3.bf16.msra.mxu0 %v1977_v36 }
 0x5cd   : > { %v1294_v28 = vpop.f32.mrf.mxu0 }
 0x5ce   : > { %v1295_v29 = vadd.f32 %v1694_v27, %v1294_v28 }
 0x5cf   : > { %v1820_v30 = vpop.f32.mrf.mxu0 }
 0x5d0   : > { %v1300_v31 = vadd.f32 %v1295_v29, %v2523_v6  ;;  %v1698_v6 = vld [vmem:[#allocation13] ss:$0 sm:$0xff] }
 0x5d1   : > { %v1297_v32 = vpop.f32.mrf.mxu0 }
 0x5d2   : > { %v1301_v33 = vpack.c.bf16 %v1300_v31, %v1300_v31 }
 0x5d3   : > { %v1821_v34 = vpop.f32.mrf.mxu0 }
 0x5d4   : > { %1827 = vmatmul.mubr.msk.bf16.vlgmr.msra.gmra.mxu1 %vm594_vm1, %v1301_v33 }
 0x694   : > { %v1362_v37 = vpop.f32.mrf.mxu1 }
 0x695   : > { %v1363_v38 = vadd.f32 %v1698_v6, %v1362_v37 }
 0x696   : > { %v1828_v39 = vpop.f32.mrf.mxu1 }
 0x697   : > { %v1368_v40 = vmax.f32 %v1363_v38, 0.0 }
 0x698   : > { %v1365_v41 = vpop.f32.mrf.mxu1 }
 0x699   : > { %v1369_v42 = vpack.c.bf16 %v1368_v40, %v1368_v40 }
 0x69a   : > { %v1829_v12 = vpop.f32.mrf.mxu1 }
 0x69b   : > { %1839 = vmatmul.mubr.msk.bf16.vlgmr.msra.gmra.mxu0 %vm1409_vm9, %v1369_v42 }
 0x69c   : > { %2139 = shalt.err (!%p2136_p5)
}
 0x69d   : > { %s2140_s12 = scalar_lea.hbm %s2645_s23, 256  ;;  %s2144_s15 = scalar_lea.hbm %s2742_s13, 512 }
 0x69e   : > { %p2141_p9 = scmp.ne.s32.totalorder %s2645_s23, %s2140_s12  ;;  %p2145_p13 = scmp.lt.s32.totalorder %s2645_s23, %s2742_s13 }
 0x69f   : > { %p2146_p8 = scmp.lt.s32.totalorder %s2144_s15, %s2140_s12 }
 0x6a0   : > { %p2142_p6 = pnand %p2141_p9, %p2449_p12 }
 0x6a1   : > { %p2147_p3 = por %p2146_p8, %p2145_p13 }
 0x6a2   : > { %p2143_p11 = pneg %p2142_p6 }
 0x6a4   : > { %p2148_p1 = pnand %p2147_p3, %p2143_p11 }
 0x6a6   : > { %2151 = shalt.err (!%p2148_p1)
}
 0x6a7   : > { %s2266_s21 = smov 64   ;;  %s2267_s14 = smov 4  }
 0x6a8   : > { %1861 = dma.vmem_to_hbm [thread:$0]  (%p2449_p12), %s2647_s20, 256, %s2645_s23, %s1461_s19, %s2266_s21, %s2266_s21, %s2267_s14  }
 0x6a9   : > { %s1674_s11 = sshll.u32 %s2479_s7, 3  ;;  %s2771_s29 = sld [smem:[#allocation30_spill]] }
 0x6aa   : > { %s1710_s22 = sshll.u32 %s2236_s28, 7  ;;  %s550_s12 = scalar_lea.vmem [#allocation14], %s1674_s11 }
 0x6ab   : > { %s1475_s8 = sshll.u32 %s550_s12, 4  ;;  %s2772_s16 = sld [smem:[#allocation31_spill]]  ;;  %s2682_s8 = int_to_ptr.vmem [resolvable:$true] %s1475_s8 }
 0x6ac   : > { %s1456_s28 = scalar_lea.sflag [#allocation7], %s2479_s7  ;;  %s2152_s20 = scalar_lea.vmem %s2682_s8, 128 }
 0x6ad   : > { %p2153_p10 = scmp.ne.s32.totalorder %s2682_s8, %s2152_s20  ;;  %s2268_s23 = smov [#allocation14]  }
 0x6ae   : > { %s2156_s19 = sshll.u32 %s2268_s23, 4  ;;  %s2157_s19 = int_to_ptr.vmem [resolvable:$false] %s2156_s19 }
 0x6af   : > { %v1702_v0 = vld [vmem:[%s2771_s29] ss:$0 sm:$0xff]  ;;  %p2154_p0 = pnand %p2153_p10, %p2449_p12  ;;  %s2158_s21 = scalar_lea.vmem %s2157_s19, 256 }
 0x6b0   : > { %p2159_p7 = scmp.lt.s32.totalorder %s2682_s8, %s2157_s19  ;;  %p2160_p4 = scmp.lt.s32.totalorder %s2158_s21, %s2152_s20 }
 0x6b1   : > { %s2680_s18 = scalar_lea.hbm %s2772_s16, %s1710_s22  ;;  %p2155_p2 = pneg %p2154_p0 }
 0x6b2   : > { %p2161_p5 = por %p2160_p4, %p2159_p7 }
 0x6b4   : > { %p2162_p9 = pnand %p2161_p5, %p2155_p2 }
 0x75b   : > { %v1447_v43 = vpop.f32.mrf.mxu0 }
 0x75c   : > { %v1448_v44 = vadd.f32 %v1702_v0, %v1447_v43 }
 0x75d   : > { %v1840_v45 = vpop.f32.mrf.mxu0 }
 0x75e   : > { %v1453_v46 = vadd.f32 %v1448_v44, %v1300_v31 }
 0x75f   : > { %v1450_v47 = vpop.f32.mrf.mxu0 }
 0x760   : > { %1454 = vst.msk [vmem:[%s550_s12] sm:$0xff] %vm594_vm1, %v1453_v46 }
 0x761   : > { %v1841_v48 = vpop.f32.mrf.mxu0 }
 0x762   : > { %2165 = shalt.err (!%p2162_p9)
}
 0x763   : > { %s2166_s14 = scalar_lea.hbm %s2680_s18, 128  ;;  %s2170_s6 = scalar_lea.hbm %s2772_s16, 256 }
 0x764   : > { %p2167_p6 = scmp.ne.s32.totalorder %s2680_s18, %s2166_s14  ;;  %p2171_p8 = scmp.lt.s32.totalorder %s2680_s18, %s2772_s16 }
 0x765   : > { %p2172_p3 = scmp.lt.s32.totalorder %s2170_s6, %s2166_s14 }
 0x766   : > { %p2168_p11 = pnand %p2167_p6, %p2449_p12 }
 0x767   : > { %p2173_p1 = por %p2172_p3, %p2171_p8 }
 0x768   : > { %p2169_p13 = pneg %p2168_p11 }
 0x76a   : > { %p2174_p10 = pnand %p2173_p1, %p2169_p13 }
 0x76c   : > { %2177 = shalt.err (!%p2174_p10)
}
 0x76d   : > { %1860 = dma.vmem_to_hbm [thread:$0]  (%p2449_p12), %s2682_s8, 128, %s2680_s18, %s1456_s28  }
 0x76e PF: > { %s2773_s22 = sld [smem:[#allocation22_spill]]  ;;  %p2774_p0 = scmp.ne.s32.totalorder %s2769_s24, 0 }
 0x76f   : > { %p2775_p2 = scmp.ge.s32.totalorder %s2244_s30, 2 }
 0x771   : > { %p1882_p7 = pnand %p2775_p2, %p2774_p0 }
 0x773   : > { %p1883_p4 = pneg %p1882_p7 }
 0x774   : > { %s1504_s12 = sand.u32 1, %s2773_s22  }
 0x775   : > { %s1505_s25 = scalar_lea.sflag [#allocation7], %s1504_s12 }
 0x776   : > { %2215 = dma.done.wait (%p1883_p4), %s1505_s25, 128  }
 0x777   : > { %2217 = vsyncadd (%p1883_p4), %s1505_s25, 4294967168  ;;  %s1514_s15 = scalar_lea.sflag [#allocation16], %s1504_s12 }
 0x778   : > { %2219 = dma.done.wait (%p1883_p4), %s1514_s15, 256  }
 0x779   : > { %2221 = vsyncadd (%p1883_p4), %s1514_s15, 4294967040  ;;  %s35_s30 = sadd.s32 1, %s2244_s30   ;;  %s2776_s17 = sld [smem:[#allocation25_spill]] }
 0x77a   : > { %p32_p5 = scmp.ge.s32.totalorder %s35_s30, 4   ;;  %s2777_s28 = sld [smem:[#allocation23_spill]] }
 0x77b   : > { %s2778_s29 = sld [smem:[#allocation24_spill]]  ;;  %s2779_s25 = smov %s2228_s26 }
 0x77c   : > { %s2780_s26 = smov %s2232_s27  ;;  %34 = sbr.rel (!%p32_p5) target bundleno = 17 (0x11), region = 159 }
 0x77f   : > { %s2781_s27 = smov %s2776_s17 }
 0x781   :  { %1519 = vsyncpa [#allocation6], 1 }
 0x782   :  { %1521 = vsyncpa [#allocation6 + $0x1], 1 }
 0x783   :  { %1522 = vsyncpa [#allocation9], 1 }
 0x784   :  { %1523 = vsyncpa [#allocation12], 1 }
 0x785   :  { %1524 = vsyncpa [#allocation7], 1 }
 0x786   :  { %1526 = vsyncpa [#allocation7 + $0x1], 1 }
 0x787   :  { %1527 = vsyncpa [#allocation16], 1 }
 0x788   :  { %1529 = vsyncpa [#allocation16 + $0x1], 1 }

</bundles_post_ra>
